<compile_context>
chip_gen: v6e
topology: v6e:2x2x1
jax: 0.10.0
libtpu: 0.0.40
codegen_flags: <defaults>
</compile_context>

<pallas_src>
import functools

import jax
import jax.numpy as jnp
import numpy as np
from jax import lax
from jax.experimental import pallas as pl
from jax.experimental.pallas import tpu as pltpu


# ---------------------------------------------------------------------------
# Pallas kernel: one grid step == one tile of TB batch elements.
# ---------------------------------------------------------------------------
def _vrp_actor_kernel(
    x_all_ref,   # (TB, N, 4)   [static(2) | dynamic(2)]
    x_org_ref,   # (TB, 1, 4)   [origin_static(2) | origin_dynamic(2)]
    w_in_ref,    # (2, 4, Hp)   [all_w1^T, org_w1^T]                (f32)
    w_hh_ref,    # (7, Hp, Hp)  [all_w2^T, org_w2^T, Watt_l^T, Watt_r^T,
                 #               fc1_l^T, fc1_r^T, fc2^T]           (mm_dtype)
    vec_ref,     # (8, Hp)      [b1a,b2a,b1o,b2o,fc1b,fc2b,v_att,v_ptr] (f32)
    probs_ref,   # (TB, N)
    *,
    mm_dtype,
):
    f32 = jnp.float32
    x = x_all_ref[...]                               # (TB, N, 4)
    tb, n, _ = x.shape
    hp = w_hh_ref.shape[-1]

    # static_input[:, 1:, :] *= (dynamic_input[:, 1:, 1] > 0)
    # dynamic feature 1 sits in column 3 of the concatenated input.
    node = lax.broadcasted_iota(jnp.int32, x.shape, 1)
    col = lax.broadcasted_iota(jnp.int32, x.shape, 2)
    active = x[:, :, 3:4] > 0.0                      # (TB, N, 1)
    keep = (node == 0) | (col >= 2) | active
    x = jnp.where(keep, x, 0.0)

    xf = x.reshape(tb * n, 4)                        # flatten batch*nodes

    w_in = w_in_ref[...]                             # (2, 4, Hp)
    vec = vec_ref[...]                               # (8, Hp)
    b1a, b2a, b1o, b2o = vec[0], vec[1], vec[2], vec[3]
    fc1b, fc2b, v_att, v_ptr = vec[4], vec[5], vec[6], vec[7]

    # ---- all_embed: Linear(4,H) -> relu -> Linear(H,H) -------------------
    h = jnp.maximum(jnp.dot(xf, w_in[0], preferred_element_type=f32) + b1a, 0.0)
    all_hidden = jnp.dot(h.astype(mm_dtype), w_hh_ref[0],
                         preferred_element_type=f32) + b2a        # (TB*N, Hp)

    # ---- origin_embed on the (TB, 4) origin rows --------------------------
    xo = x_org_ref[...].reshape(tb, 4)
    ho = jnp.maximum(jnp.dot(xo, w_in[1], preferred_element_type=f32) + b1o, 0.0)
    origin_hidden = jnp.dot(ho.astype(mm_dtype), w_hh_ref[1],
                            preferred_element_type=f32) + b2o     # (TB, Hp)

    ah_mm = all_hidden.astype(mm_dtype)
    oh_mm = origin_hidden.astype(mm_dtype)
    ah3 = all_hidden.reshape(tb, n, hp)                           # (TB, N, Hp)

    # ---- Attention: softmax_n( v . tanh(W_l a_n + W_r o) ) ---------------
    u_all = jnp.dot(ah_mm, w_hh_ref[2], preferred_element_type=f32)   # (TB*N, Hp)
    u_org = jnp.dot(oh_mm, w_hh_ref[3], preferred_element_type=f32)   # (TB, Hp)
    u = u_all.reshape(tb, n, hp) + u_org[:, None, :]
    logits = jnp.sum(jnp.tanh(u) * v_att, axis=-1)                    # (TB, N)
    logits = logits - jnp.max(logits, axis=-1, keepdims=True)
    e = jnp.exp(logits)
    attn = e / jnp.sum(e, axis=-1, keepdims=True)                     # (TB, N)

    # context_b = sum_n attn[b,n] * all_hidden[b,n,:]
    context = jnp.sum(attn[:, :, None] * ah3, axis=1)                 # (TB, Hp)

    # ---- Pointer MLP on cat(origin_hidden, context) -----------------------
    o1 = jnp.maximum(
        jnp.dot(oh_mm, w_hh_ref[4], preferred_element_type=f32)
        + jnp.dot(context.astype(mm_dtype), w_hh_ref[5], preferred_element_type=f32)
        + fc1b, 0.0)                                                  # (TB, Hp)
    o2 = jnp.maximum(
        jnp.dot(o1.astype(mm_dtype), w_hh_ref[6], preferred_element_type=f32)
        + fc2b, 0.0)                                                  # (TB, Hp)

    # probs[b, n] = v_ptr . tanh(all_hidden[b, n, :] + o2[b, :])
    probs_ref[...] = jnp.sum(jnp.tanh(ah3 + o2[:, None, :]) * v_ptr, axis=-1)


# ---------------------------------------------------------------------------
# Helpers: batch-tile selection + parameter packing/padding
# ---------------------------------------------------------------------------
def _pick_block_b(B, N, block_b):
    if block_b is None:
        block_b = max(1, -(-256 // N))        # target >= 256 rows per MXU tile
    if block_b >= B:
        return B                              # single step: block == full array
    return max(8, (block_b // 8) * 8)         # keep (8,128) sublane alignment


def _prep_kernel_params(params, Hp, matmul_dtype):
    f32 = jnp.float32
    H = params["all_w2"].shape[0]

    def pad_in(w):     # (H, 4) -> transposed (4, Hp)
        return jnp.pad(w.astype(f32).T, ((0, 0), (0, Hp - H)))

    def pad_hh(w):     # (H, H) in "x @ w" form -> (Hp, Hp)
        return jnp.pad(w.astype(f32), ((0, Hp - w.shape[0]), (0, Hp - w.shape[1])))

    def pad_vec(v):    # (H,) -> (Hp,)
        return jnp.pad(v.astype(f32), (0, Hp - v.shape[0]))

    W_att = params["att_W"][0]     # (H, 2H)
    fc1 = params["fc1_w"]          # (H, 2H)

    w_in = jnp.stack([pad_in(params["all_w1"]), pad_in(params["org_w1"])])   # (2,4,Hp)
    w_hh = jnp.stack([
        pad_hh(params["all_w2"].T), pad_hh(params["org_w2"].T),
        pad_hh(W_att[:, :H].T),     pad_hh(W_att[:, H:].T),
        pad_hh(fc1[:, :H].T),       pad_hh(fc1[:, H:].T),
        pad_hh(params["fc2_w"].T),
    ]).astype(matmul_dtype)                                                   # (7,Hp,Hp)
    vecs = jnp.stack([
        pad_vec(params["all_b1"]), pad_vec(params["all_b2"]),
        pad_vec(params["org_b1"]), pad_vec(params["org_b2"]),
        pad_vec(params["fc1_b"]),  pad_vec(params["fc2_b"]),
        pad_vec(params["att_v"][0, 0]), pad_vec(params["ptr_v"][0, 0]),
    ])                                                                        # (8,Hp)
    return w_in, w_hh, vecs


# ---------------------------------------------------------------------------
# Wrapper: parameter plumbing + pallas_call
# ---------------------------------------------------------------------------
@functools.partial(jax.jit, static_argnames=("block_b", "matmul_dtype"))
def vrp_actor_forward(params, static_input, dynamic_input_float,
                      origin_static_input, origin_dynamic_input_float, mask,
                      *, block_b=None, matmul_dtype=jnp.bfloat16):
    # `mask` is accepted for signature parity with the PyTorch module but is
    # not used by its forward pass.
    del mask
    f32 = jnp.float32
    B, N, _ = static_input.shape
    H = params["all_w2"].shape[0]
    Hp = ((H + 127) // 128) * 128                 # lane-dense hidden dim

    x_all = jnp.concatenate([static_input, dynamic_input_float], axis=2).astype(f32)      # (B,N,4)
    x_org = jnp.concatenate(
        [origin_static_input, origin_dynamic_input_float], axis=1)[:, None, :].astype(f32)  # (B,1,4)

    tb = _pick_block_b(B, N, block_b)
    B_pad = -(-B // tb) * tb
    if B_pad != B:                                # zero-pad batch tail
        x_all = jnp.pad(x_all, ((0, B_pad - B), (0, 0), (0, 0)))
        x_org = jnp.pad(x_org, ((0, B_pad - B), (0, 0), (0, 0)))

    w_in, w_hh, vecs = _prep_kernel_params(params, Hp, matmul_dtype)

    flops = 2 * B_pad * (N * Hp * (2 * Hp + 8) + 5 * Hp * Hp + 8 * Hp)
    transcendentals = B_pad * (2 * N * Hp + N)
    bytes_accessed = (4 * (x_all.size + x_org.size + B_pad * N
                           + w_in.size + vecs.size)
                      + w_hh.size * w_hh.dtype.itemsize)

    kernel = functools.partial(_vrp_actor_kernel, mm_dtype=matmul_dtype)

    probs = pl.pallas_call(
        kernel,
        out_shape=jax.ShapeDtypeStruct((B_pad, N), f32),
        grid_spec=pltpu.PrefetchScalarGridSpec(
            num_scalar_prefetch=0,
            grid=(B_pad // tb,),
            in_specs=[
                pl.BlockSpec((tb, N, 4), lambda b: (b, 0, 0)),     # x_all tile
                pl.BlockSpec((tb, 1, 4), lambda b: (b, 0, 0)),     # x_org tile
                pl.BlockSpec(w_in.shape, lambda b: (0, 0, 0)),     # packed params:
                pl.BlockSpec(w_hh.shape, lambda b: (0, 0, 0)),     # constant index_map
                pl.BlockSpec(vecs.shape, lambda b: (0, 0)),        # => DMA'd once
            ],
            out_specs=pl.BlockSpec((tb, N), lambda b: (b, 0)),
        ),
        compiler_params=pltpu.CompilerParams(dimension_semantics=("parallel",)),
        cost_estimate=pl.CostEstimate(flops=flops,
                                      transcendentals=transcendentals,
                                      bytes_accessed=bytes_accessed),
    )(x_all, x_org, w_in, w_hh, vecs)

    return probs[:B]                              # (B, N)


# ---------------------------------------------------------------------------
# Pure-JAX reference (mirrors the PyTorch forward), full-precision matmuls.
# ---------------------------------------------------------------------------
def vrp_actor_reference(params, static_input, dynamic_input, origin_static, origin_dynamic):
    hi = jax.lax.Precision.HIGHEST
    active = (dynamic_input[:, 1:, 1] > 0).astype(static_input.dtype)[..., None]
    static_m = jnp.concatenate([static_input[:, :1], static_input[:, 1:] * active], axis=1)
    x_all = jnp.concatenate([static_m, dynamic_input], axis=2)
    h = jnp.maximum(jnp.einsum("bnf,hf->bnh", x_all, params["all_w1"], precision=hi)
                    + params["all_b1"], 0.0)
    all_hidden = (jnp.einsum("bnk,hk->bnh", h, params["all_w2"], precision=hi)
                  + params["all_b2"])                                           # (B,N,H)

    x_org = jnp.concatenate([origin_static, origin_dynamic], axis=1)[:, None, :]
    ho = jnp.maximum(jnp.einsum("bnf,hf->bnh", x_org, params["org_w1"], precision=hi)
                     + params["org_b1"], 0.0)
    origin_hidden = (jnp.einsum("bnk,hk->bnh", ho, params["org_w2"], precision=hi)
                     + params["org_b2"])                                        # (B,1,H)

    W = params["att_W"][0]                                                      # (H, 2H)
    v = params["att_v"][0, 0]                                                   # (H,)
    hidden_cat = jnp.concatenate(
        [all_hidden, jnp.broadcast_to(origin_hidden, all_hidden.shape)], axis=2)  # (B,N,2H)
    u = jnp.tanh(jnp.einsum("bnk,hk->bnh", hidden_cat, W, precision=hi))
    logits = jnp.einsum("bnh,h->bn", u, v, precision=hi)
    attn = jax.nn.softmax(logits, axis=1)
    context = jnp.einsum("bn,bnh->bh", attn, all_hidden, precision=hi)
    inp = jnp.concatenate([origin_hidden[:, 0], context], axis=1)               # (B,2H)
    o1 = jnp.maximum(jnp.einsum("bk,hk->bh", inp, params["fc1_w"], precision=hi)
                     + params["fc1_b"], 0.0)
    o2 = jnp.maximum(jnp.einsum("bk,hk->bh", o1, params["fc2_w"], precision=hi)
                     + params["fc2_b"], 0.0)                                    # (B,H)
    probs = jnp.einsum("h,bnh->bn", params["ptr_v"][0, 0],
                       jnp.tanh(all_hidden + o2[:, None, :]), precision=hi)
    return probs


# ---------------------------------------------------------------------------
# Deterministic parameter init (xavier-style uniform, like the module's init).
# ---------------------------------------------------------------------------
def make_params(key, hidden_size):
    H = hidden_size

    def xavier(k, shape):
        fan_in, fan_out = shape[-1], shape[-2]
        limit = float(np.sqrt(6.0 / (fan_in + fan_out)))
        return jax.random.uniform(k, shape, jnp.float32, -limit, limit)

    def bias(k, shape, fan_in):
        limit = float(1.0 / np.sqrt(fan_in))
        return jax.random.uniform(k, shape, jnp.float32, -limit, limit)

    ks = jax.random.split(key, 15)
    return {
        "all_w1": xavier(ks[0], (H, 4)),      "all_b1": bias(ks[1], (H,), 4),
        "all_w2": xavier(ks[2], (H, H)),      "all_b2": bias(ks[3], (H,), H),
        "org_w1": xavier(ks[4], (H, 4)),      "org_b1": bias(ks[5], (H,), 4),
        "org_w2": xavier(ks[6], (H, H)),      "org_b2": bias(ks[7], (H,), H),
        "att_v":  xavier(ks[8], (1, 1, H)),
        "att_W":  xavier(ks[9], (1, H, 2 * H)),
        "ptr_v":  xavier(ks[10], (1, 1, H)),
        "fc1_w":  xavier(ks[11], (H, 2 * H)), "fc1_b": bias(ks[12], (H,), 2 * H),
        "fc2_w":  xavier(ks[13], (H, H)),     "fc2_b": bias(ks[14], (H,), H),
    }


if __name__ == "__main__":
    B, N, H = 20, 8, 128      # H=128 is the module's default hidden size

    root = jax.random.PRNGKey(0)
    kp, k1, k2, k3, k4 = jax.random.split(root, 5)
    params = make_params(kp, H)

    static_input = jax.random.normal(k1, (B, N, 2), jnp.float32)
    # dynamic feature 1 is ~half negative so the active-input mask is non-trivial
    dynamic_input = jax.random.normal(k2, (B, N, 2), jnp.float32)
    origin_static = jax.random.normal(k3, (B, 2), jnp.float32)
    origin_dynamic = jax.random.normal(k4, (B, 2), jnp.float32)
    mask = jnp.ones((B, N), jnp.float32)   # unused by the forward pass

    ref = vrp_actor_reference(params, static_input, dynamic_input,
                              origin_static, origin_dynamic)

    # 1) f32-matmul path with an explicit small batch tile: exercises a
    #    multi-step grid (grid=3) and the zero-padded batch tail.
    p_f32 = vrp_actor_forward(params, static_input, dynamic_input,
                              origin_static, origin_dynamic, mask,
                              block_b=8, matmul_dtype=jnp.float32)
    p_f32 = jax.block_until_ready(p_f32)
    np.testing.assert_allclose(np.asarray(p_f32), np.asarray(ref), rtol=2e-2, atol=2e-2)

    # 2) default path: auto batch tile (single step here) + bf16 MXU operands
    #    with f32 accumulation.
    p_bf16 = vrp_actor_forward(params, static_input, dynamic_input,
                               origin_static, origin_dynamic, mask)
    p_bf16 = jax.block_until_ready(p_bf16)
    np.testing.assert_allclose(np.asarray(p_bf16), np.asarray(ref), rtol=3e-2, atol=3e-2)

    print("KERNEL_OK")
</pallas_src>

<mosaic_0001>
module attributes {stable_mosaic.version = 11 : i64} {
  func.func @_vrp_actor_kernel(%arg0: i32, %arg1: memref<8x8x4xf32, #tpu.memory_space<vmem>>, %arg2: memref<8x1x4xf32, #tpu.memory_space<vmem>>, %arg3: memref<2x4x128xf32, #tpu.memory_space<vmem>>, %arg4: memref<7x128x128xf32, #tpu.memory_space<vmem>>, %arg5: memref<8x128xf32, #tpu.memory_space<vmem>>, %arg6: memref<8x8xf32, #tpu.memory_space<vmem>>) attributes {dimension_semantics = [#tpu.dimension_semantics<parallel>], iteration_bounds = array<i64: 3>, scalar_prefetch = 0 : i64, scratch_operands = 0 : i64, tpu.core_type = #tpu.core_type<tc>, window_params = [{transform_indices = @transform_0, window_bounds = array<i64: 8, 8, 4>}, {transform_indices = @transform_1, window_bounds = array<i64: 8, 1, 4>}, {pipeline_mode = #tpu.pipeline_mode<synchronous>, transform_indices = @transform_2, window_bounds = array<i64: 2, 4, 128>}, {pipeline_mode = #tpu.pipeline_mode<synchronous>, transform_indices = @transform_3, window_bounds = array<i64: 7, 128, 128>}, {pipeline_mode = #tpu.pipeline_mode<synchronous>, transform_indices = @transform_4, window_bounds = array<i64: 8, 128>}, {transform_indices = @transform_5, window_bounds = array<i64: 8, 8>}]} {
    %c0 = arith.constant 0 : index
    %c0_0 = arith.constant 0 : index
    %c0_1 = arith.constant 0 : index
    %0 = vector.load %arg1[%c0, %c0_0, %c0_1] : memref<8x8x4xf32, #tpu.memory_space<vmem>>, vector<8x8x4xf32>
    %1 = tpu.iota {dimensions = array<i32: 1>} : vector<8x8x4xi32>
    %2 = tpu.iota {dimensions = array<i32: 2>} : vector<8x8x4xi32>
    %3 = vector.extract_strided_slice %0 {offsets = [0, 0, 3], sizes = [8, 8, 1], strides = [1, 1, 1]} : vector<8x8x4xf32> to vector<8x8x1xf32>
    %cst = arith.constant 0.000000e+00 : f32
    %4 = vector.broadcast %cst : f32 to vector<8x8x1xf32>
    %5 = arith.cmpf ogt, %3, %4 : vector<8x8x1xf32>
    %c0_i32 = arith.constant 0 : i32
    %6 = vector.broadcast %c0_i32 : i32 to vector<8x8x4xi32>
    %7 = arith.cmpi eq, %1, %6 : vector<8x8x4xi32>
    %c2_i32 = arith.constant 2 : i32
    %8 = vector.broadcast %c2_i32 : i32 to vector<8x8x4xi32>
    %9 = arith.cmpi sge, %2, %8 : vector<8x8x4xi32>
    %10 = arith.ori %7, %9 : vector<8x8x4xi1>
    %11 = vector.broadcast %5 : vector<8x8x1xi1> to vector<8x8x4xi1>
    %12 = arith.ori %10, %11 : vector<8x8x4xi1>
    %cst_2 = arith.constant 0.000000e+00 : f32
    %13 = vector.broadcast %cst_2 : f32 to vector<8x8x4xf32>
    %14 = arith.select %12, %0, %13 : vector<8x8x4xi1>, vector<8x8x4xf32>
    %15 = vector.shape_cast %14 : vector<8x8x4xf32> to vector<64x4xf32>
    %c0_3 = arith.constant 0 : index
    %c0_4 = arith.constant 0 : index
    %c0_5 = arith.constant 0 : index
    %16 = vector.load %arg3[%c0_3, %c0_4, %c0_5] : memref<2x4x128xf32, #tpu.memory_space<vmem>>, vector<2x4x128xf32>
    %c0_6 = arith.constant 0 : index
    %c0_7 = arith.constant 0 : index
    %17 = vector.load %arg5[%c0_6, %c0_7] : memref<8x128xf32, #tpu.memory_space<vmem>>, vector<8x128xf32>
    %18 = vector.extract_strided_slice %17 {offsets = [0, 0], sizes = [1, 128], strides = [1, 1]} : vector<8x128xf32> to vector<1x128xf32>
    %19 = vector.shape_cast %18 : vector<1x128xf32> to vector<128xf32>
    %20 = vector.extract_strided_slice %17 {offsets = [1, 0], sizes = [1, 128], strides = [1, 1]} : vector<8x128xf32> to vector<1x128xf32>
    %21 = vector.shape_cast %20 : vector<1x128xf32> to vector<128xf32>
    %22 = vector.extract_strided_slice %17 {offsets = [2, 0], sizes = [1, 128], strides = [1, 1]} : vector<8x128xf32> to vector<1x128xf32>
    %23 = vector.shape_cast %22 : vector<1x128xf32> to vector<128xf32>
    %24 = vector.extract_strided_slice %17 {offsets = [3, 0], sizes = [1, 128], strides = [1, 1]} : vector<8x128xf32> to vector<1x128xf32>
    %25 = vector.shape_cast %24 : vector<1x128xf32> to vector<128xf32>
    %26 = vector.extract_strided_slice %17 {offsets = [4, 0], sizes = [1, 128], strides = [1, 1]} : vector<8x128xf32> to vector<1x128xf32>
    %27 = vector.shape_cast %26 : vector<1x128xf32> to vector<128xf32>
    %28 = vector.extract_strided_slice %17 {offsets = [5, 0], sizes = [1, 128], strides = [1, 1]} : vector<8x128xf32> to vector<1x128xf32>
    %29 = vector.shape_cast %28 : vector<1x128xf32> to vector<128xf32>
    %30 = vector.extract_strided_slice %17 {offsets = [6, 0], sizes = [1, 128], strides = [1, 1]} : vector<8x128xf32> to vector<1x128xf32>
    %31 = vector.shape_cast %30 : vector<1x128xf32> to vector<128xf32>
    %32 = vector.extract_strided_slice %17 {offsets = [7, 0], sizes = [1, 128], strides = [1, 1]} : vector<8x128xf32> to vector<1x128xf32>
    %33 = vector.shape_cast %32 : vector<1x128xf32> to vector<128xf32>
    %34 = vector.extract_strided_slice %16 {offsets = [0, 0, 0], sizes = [1, 4, 128], strides = [1, 1, 1]} : vector<2x4x128xf32> to vector<1x4x128xf32>
    %35 = vector.shape_cast %34 : vector<1x4x128xf32> to vector<4x128xf32>
    %cst_8 = arith.constant dense<0.000000e+00> : vector<64x128xf32>
    %36 = tpu.matmul %15, %35, %cst_8 {dimension_numbers = #tpu.dot_dimension_numbers<[1], [0], [0], [1], [0, 0, 1, 1], [], []>} : vector<64x4xf32>, vector<4x128xf32>, vector<64x128xf32> -> vector<64x128xf32>
    %37 = vector.shape_cast %19 : vector<128xf32> to vector<1x128xf32>
    %38 = vector.broadcast %37 : vector<1x128xf32> to vector<64x128xf32>
    %39 = arith.addf %36, %38 : vector<64x128xf32>
    %cst_9 = arith.constant 0.000000e+00 : f32
    %40 = vector.broadcast %cst_9 : f32 to vector<64x128xf32>
    %41 = arith.maximumf %39, %40 : vector<64x128xf32>
    %c0_10 = arith.constant 0 : index
    %c0_11 = arith.constant 0 : index
    %c0_12 = arith.constant 0 : index
    %42 = vector.load %arg4[%c0_10, %c0_11, %c0_12] : memref<7x128x128xf32, #tpu.memory_space<vmem>>, vector<1x128x128xf32>
    %43 = vector.shape_cast %42 : vector<1x128x128xf32> to vector<128x128xf32>
    %cst_13 = arith.constant dense<0.000000e+00> : vector<64x128xf32>
    %44 = tpu.matmul %41, %43, %cst_13 {dimension_numbers = #tpu.dot_dimension_numbers<[1], [0], [0], [1], [0, 0, 1, 1], [], []>} : vector<64x128xf32>, vector<128x128xf32>, vector<64x128xf32> -> vector<64x128xf32>
    %45 = vector.shape_cast %21 : vector<128xf32> to vector<1x128xf32>
    %46 = vector.broadcast %45 : vector<1x128xf32> to vector<64x128xf32>
    %47 = arith.addf %44, %46 : vector<64x128xf32>
    %c0_14 = arith.constant 0 : index
    %c0_15 = arith.constant 0 : index
    %c0_16 = arith.constant 0 : index
    %48 = vector.load %arg2[%c0_14, %c0_15, %c0_16] : memref<8x1x4xf32, #tpu.memory_space<vmem>>, vector<8x1x4xf32>
    %49 = vector.shape_cast %48 : vector<8x1x4xf32> to vector<8x4xf32>
    %50 = vector.extract_strided_slice %16 {offsets = [1, 0, 0], sizes = [1, 4, 128], strides = [1, 1, 1]} : vector<2x4x128xf32> to vector<1x4x128xf32>
    %51 = vector.shape_cast %50 : vector<1x4x128xf32> to vector<4x128xf32>
    %cst_17 = arith.constant dense<0.000000e+00> : vector<8x128xf32>
    %52 = tpu.matmul %49, %51, %cst_17 {dimension_numbers = #tpu.dot_dimension_numbers<[1], [0], [0], [1], [0, 0, 1, 1], [], []>} : vector<8x4xf32>, vector<4x128xf32>, vector<8x128xf32> -> vector<8x128xf32>
    %53 = vector.shape_cast %23 : vector<128xf32> to vector<1x128xf32>
    %54 = vector.broadcast %53 : vector<1x128xf32> to vector<8x128xf32>
    %55 = arith.addf %52, %54 : vector<8x128xf32>
    %cst_18 = arith.constant 0.000000e+00 : f32
    %56 = vector.broadcast %cst_18 : f32 to vector<8x128xf32>
    %57 = arith.maximumf %55, %56 : vector<8x128xf32>
    %c1 = arith.constant 1 : index
    %c0_19 = arith.constant 0 : index
    %c0_20 = arith.constant 0 : index
    %58 = vector.load %arg4[%c1, %c0_19, %c0_20] : memref<7x128x128xf32, #tpu.memory_space<vmem>>, vector<1x128x128xf32>
    %59 = vector.shape_cast %58 : vector<1x128x128xf32> to vector<128x128xf32>
    %cst_21 = arith.constant dense<0.000000e+00> : vector<8x128xf32>
    %60 = tpu.matmul %57, %59, %cst_21 {dimension_numbers = #tpu.dot_dimension_numbers<[1], [0], [0], [1], [0, 0, 1, 1], [], []>} : vector<8x128xf32>, vector<128x128xf32>, vector<8x128xf32> -> vector<8x128xf32>
    %61 = vector.shape_cast %25 : vector<128xf32> to vector<1x128xf32>
    %62 = vector.broadcast %61 : vector<1x128xf32> to vector<8x128xf32>
    %63 = arith.addf %60, %62 : vector<8x128xf32>
    %64 = vector.shape_cast %47 : vector<64x128xf32> to vector<8x8x128xf32>
    %c2 = arith.constant 2 : index
    %c0_22 = arith.constant 0 : index
    %c0_23 = arith.constant 0 : index
    %65 = vector.load %arg4[%c2, %c0_22, %c0_23] : memref<7x128x128xf32, #tpu.memory_space<vmem>>, vector<1x128x128xf32>
    %66 = vector.shape_cast %65 : vector<1x128x128xf32> to vector<128x128xf32>
    %cst_24 = arith.constant dense<0.000000e+00> : vector<64x128xf32>
    %67 = tpu.matmul %47, %66, %cst_24 {dimension_numbers = #tpu.dot_dimension_numbers<[1], [0], [0], [1], [0, 0, 1, 1], [], []>} : vector<64x128xf32>, vector<128x128xf32>, vector<64x128xf32> -> vector<64x128xf32>
    %c3 = arith.constant 3 : index
    %c0_25 = arith.constant 0 : index
    %c0_26 = arith.constant 0 : index
    %68 = vector.load %arg4[%c3, %c0_25, %c0_26] : memref<7x128x128xf32, #tpu.memory_space<vmem>>, vector<1x128x128xf32>
    %69 = vector.shape_cast %68 : vector<1x128x128xf32> to vector<128x128xf32>
    %cst_27 = arith.constant dense<0.000000e+00> : vector<8x128xf32>
    %70 = tpu.matmul %63, %69, %cst_27 {dimension_numbers = #tpu.dot_dimension_numbers<[1], [0], [0], [1], [0, 0, 1, 1], [], []>} : vector<8x128xf32>, vector<128x128xf32>, vector<8x128xf32> -> vector<8x128xf32>
    %71 = vector.shape_cast %67 : vector<64x128xf32> to vector<8x8x128xf32>
    %72 = vector.shape_cast %70 : vector<8x128xf32> to vector<8x1x128xf32>
    %73 = vector.broadcast %72 : vector<8x1x128xf32> to vector<8x8x128xf32>
    %74 = arith.addf %71, %73 : vector<8x8x128xf32>
    %75 = math.tanh %74 : vector<8x8x128xf32>
    %76 = vector.shape_cast %31 : vector<128xf32> to vector<1x1x128xf32>
    %77 = vector.broadcast %76 : vector<1x1x128xf32> to vector<8x8x128xf32>
    %78 = arith.mulf %75, %77 : vector<8x8x128xf32>
    %cst_28 = arith.constant dense<0.000000e+00> : vector<8x8xf32>
    %79 = vector.multi_reduction <add>, %78, %cst_28 [2] : vector<8x8x128xf32> to vector<8x8xf32>
    %cst_29 = arith.constant dense<0xFF800000> : vector<8xf32>
    %80 = vector.multi_reduction <maximumf>, %79, %cst_29 [1] : vector<8x8xf32> to vector<8xf32>
    %81 = vector.shape_cast %80 : vector<8xf32> to vector<8x1xf32>
    %82 = vector.broadcast %81 : vector<8x1xf32> to vector<8x8xf32>
    %83 = arith.subf %79, %82 : vector<8x8xf32>
    %84 = math.exp %83 : vector<8x8xf32>
    %cst_30 = arith.constant dense<0.000000e+00> : vector<8xf32>
    %85 = vector.multi_reduction <add>, %84, %cst_30 [1] : vector<8x8xf32> to vector<8xf32>
    %86 = vector.shape_cast %85 : vector<8xf32> to vector<8x1xf32>
    %87 = vector.broadcast %86 : vector<8x1xf32> to vector<8x8xf32>
    %88 = arith.divf %84, %87 : vector<8x8xf32>
    %89 = vector.shape_cast %88 : vector<8x8xf32> to vector<8x8x1xf32>
    %90 = vector.broadcast %89 : vector<8x8x1xf32> to vector<8x8x128xf32>
    %91 = arith.mulf %90, %64 : vector<8x8x128xf32>
    %cst_31 = arith.constant dense<0.000000e+00> : vector<8x128xf32>
    %92 = vector.multi_reduction <add>, %91, %cst_31 [1] : vector<8x8x128xf32> to vector<8x128xf32>
    %c4 = arith.constant 4 : index
    %c0_32 = arith.constant 0 : index
    %c0_33 = arith.constant 0 : index
    %93 = vector.load %arg4[%c4, %c0_32, %c0_33] : memref<7x128x128xf32, #tpu.memory_space<vmem>>, vector<1x128x128xf32>
    %94 = vector.shape_cast %93 : vector<1x128x128xf32> to vector<128x128xf32>
    %cst_34 = arith.constant dense<0.000000e+00> : vector<8x128xf32>
    %95 = tpu.matmul %63, %94, %cst_34 {dimension_numbers = #tpu.dot_dimension_numbers<[1], [0], [0], [1], [0, 0, 1, 1], [], []>} : vector<8x128xf32>, vector<128x128xf32>, vector<8x128xf32> -> vector<8x128xf32>
    %c5 = arith.constant 5 : index
    %c0_35 = arith.constant 0 : index
    %c0_36 = arith.constant 0 : index
    %96 = vector.load %arg4[%c5, %c0_35, %c0_36] : memref<7x128x128xf32, #tpu.memory_space<vmem>>, vector<1x128x128xf32>
    %97 = vector.shape_cast %96 : vector<1x128x128xf32> to vector<128x128xf32>
    %cst_37 = arith.constant dense<0.000000e+00> : vector<8x128xf32>
    %98 = tpu.matmul %92, %97, %cst_37 {dimension_numbers = #tpu.dot_dimension_numbers<[1], [0], [0], [1], [0, 0, 1, 1], [], []>} : vector<8x128xf32>, vector<128x128xf32>, vector<8x128xf32> -> vector<8x128xf32>
    %99 = arith.addf %95, %98 : vector<8x128xf32>
    %100 = vector.shape_cast %27 : vector<128xf32> to vector<1x128xf32>
    %101 = vector.broadcast %100 : vector<1x128xf32> to vector<8x128xf32>
    %102 = arith.addf %99, %101 : vector<8x128xf32>
    %cst_38 = arith.constant 0.000000e+00 : f32
    %103 = vector.broadcast %cst_38 : f32 to vector<8x128xf32>
    %104 = arith.maximumf %102, %103 : vector<8x128xf32>
    %c6 = arith.constant 6 : index
    %c0_39 = arith.constant 0 : index
    %c0_40 = arith.constant 0 : index
    %105 = vector.load %arg4[%c6, %c0_39, %c0_40] : memref<7x128x128xf32, #tpu.memory_space<vmem>>, vector<1x128x128xf32>
    %106 = vector.shape_cast %105 : vector<1x128x128xf32> to vector<128x128xf32>
    %cst_41 = arith.constant dense<0.000000e+00> : vector<8x128xf32>
    %107 = tpu.matmul %104, %106, %cst_41 {dimension_numbers = #tpu.dot_dimension_numbers<[1], [0], [0], [1], [0, 0, 1, 1], [], []>} : vector<8x128xf32>, vector<128x128xf32>, vector<8x128xf32> -> vector<8x128xf32>
    %108 = vector.shape_cast %29 : vector<128xf32> to vector<1x128xf32>
    %109 = vector.broadcast %108 : vector<1x128xf32> to vector<8x128xf32>
    %110 = arith.addf %107, %109 : vector<8x128xf32>
    %cst_42 = arith.constant 0.000000e+00 : f32
    %111 = vector.broadcast %cst_42 : f32 to vector<8x128xf32>
    %112 = arith.maximumf %110, %111 : vector<8x128xf32>
    %113 = vector.shape_cast %112 : vector<8x128xf32> to vector<8x1x128xf32>
    %114 = vector.broadcast %113 : vector<8x1x128xf32> to vector<8x8x128xf32>
    %115 = arith.addf %64, %114 : vector<8x8x128xf32>
    %116 = math.tanh %115 : vector<8x8x128xf32>
    %117 = vector.shape_cast %33 : vector<128xf32> to vector<1x1x128xf32>
    %118 = vector.broadcast %117 : vector<1x1x128xf32> to vector<8x8x128xf32>
    %119 = arith.mulf %116, %118 : vector<8x8x128xf32>
    %cst_43 = arith.constant dense<0.000000e+00> : vector<8x8xf32>
    %120 = vector.multi_reduction <add>, %119, %cst_43 [2] : vector<8x8x128xf32> to vector<8x8xf32>
    %c0_44 = arith.constant 0 : index
    %c0_45 = arith.constant 0 : index
    %121 = vector.load %arg6[%c0_44, %c0_45] : memref<8x8xf32, #tpu.memory_space<vmem>>, vector<8x8xf32>
    tpu.vector_store %arg6[%c0_44, %c0_45], %120 {strides = array<i32>} : memref<8x8xf32, #tpu.memory_space<vmem>>, vector<8x8xf32>,
    return
  }
  func.func @transform_0(%arg0: i32) -> (i32, i32, i32) {
    %c0_i32 = arith.constant 0 : i32
    %c0_i32_0 = arith.constant 0 : i32
    %c0_i32_1 = arith.constant 0 : i32
    return %arg0, %c0_i32, %c0_i32_0 : i32, i32, i32
  }
  func.func @transform_1(%arg0: i32) -> (i32, i32, i32) {
    %c0_i32 = arith.constant 0 : i32
    %c0_i32_0 = arith.constant 0 : i32
    %c0_i32_1 = arith.constant 0 : i32
    return %arg0, %c0_i32, %c0_i32_0 : i32, i32, i32
  }
  func.func @transform_2(%arg0: i32) -> (i32, i32, i32) {
    %c0_i32 = arith.constant 0 : i32
    %c0_i32_0 = arith.constant 0 : i32
    %c0_i32_1 = arith.constant 0 : i32
    %c0_i32_2 = arith.constant 0 : i32
    return %c0_i32, %c0_i32_0, %c0_i32_1 : i32, i32, i32
  }
  func.func @transform_3(%arg0: i32) -> (i32, i32, i32) {
    %c0_i32 = arith.constant 0 : i32
    %c0_i32_0 = arith.constant 0 : i32
    %c0_i32_1 = arith.constant 0 : i32
    %c0_i32_2 = arith.constant 0 : i32
    return %c0_i32, %c0_i32_0, %c0_i32_1 : i32, i32, i32
  }
  func.func @transform_4(%arg0: i32) -> (i32, i32) {
    %c0_i32 = arith.constant 0 : i32
    %c0_i32_0 = arith.constant 0 : i32
    %c0_i32_1 = arith.constant 0 : i32
    return %c0_i32, %c0_i32_0 : i32, i32
  }
  func.func @transform_5(%arg0: i32) -> (i32, i32) {
    %c0_i32 = arith.constant 0 : i32
    %c0_i32_0 = arith.constant 0 : i32
    return %arg0, %c0_i32 : i32, i32
  }
}

</mosaic_0001>

<bundles_post_ra>
// kernel: vrp_actor_forward.1
= control target key start
LH: loop header
LB: loop body
LE: loop exit
PB: predicated region body
PF: predicated region fallthrough
CT: control target
= control target key end

     0   :  { %s2730_s18 = smov 0   ;;  %s3492_s0 = inlined_call_operand.vmem [shape: f32[24,8,4], index: 0, kind: input, shape index: {}]   ;;  %s3493_s1 = inlined_call_operand.vmem [shape: f32[24,1,4], index: 1, kind: input, shape index: {}]   ;;  %s3494_s2 = inlined_call_operand.vmem [shape: f32[2,4,128], index: 2, kind: input, shape index: {}]   ;;  %s3495_s3 = inlined_call_operand.vmem [shape: f32[7,128,128], index: 3, kind: input, shape index: {}]   ;;  %s3496_s4 = inlined_call_operand.vmem [shape: f32[8,128], index: 4, kind: input, shape index: {}]   ;;  %s3497_s5 = inlined_call_operand.vmem [shape: f32[24,8], index: 5, kind: output, shape index: {}]  }
   0x1 LB: > { %s2736_s19 = sadd.s32 4294967295, %s2693_s18   ;;  %p2065_p0 = scmp.ge.s32.totalorder %s2693_s18, 1  ;;  %s2693_s18 = sphi %s2730_s18, %s15_s18  }
   0x2   : > { %p198_p1 = scmp.lt.s32.totalorder %s2693_s18, 4 }
   0x4   : > { %p199_p2 = pnand %p2065_p0, %p198_p1 }
   0x5   : > { %s2066_s20 = sshll.u32 (!%p199_p2), %s2736_s19, 3  ;;  %p240_p4 = scmp.lt.s32.totalorder (!%p199_p2), %s2736_s19, 2 }
   0x6   : > { %202 = sbr.rel (%p199_p2) target bundleno = 2154 (0x86a), region = 40  ;;  %p230_p3 = scmp.lt.s32.totalorder (!%p199_p2), %s2066_s20, 23 }
   0xb   : > { %v2695_v0 = vmov 3   ;;  %s3505_s20 = smov (!%p230_p3, %s2066_s20), 23  ;;  %v2696_v5 = vmov 0   ;;  %v323_v12 = vld [vmem:[%s3494_s2] sm:$0xf]  ;;  %vm355_vm6 = vcmask 1043456   ;;  %v252_v32 = vlaneseq }
   0xc   : > { %2619 = vset.pattern.permute.xlu1 %v2695_v0  ;;  %2618 = vset.pattern.permute.xlu0 %v2695_v0  ;;  %s2067_s21 = sshll.u32 %s3505_s20, 3  ;;  %v2697_v17 = vmov 0.0   ;;  %v487_v20 = vld [vmem:[%s3495_s3 + $0x78] sm:$0xff]  ;;  %v486_v21 = vld [vmem:[%s3495_s3 + $0x70] sm:$0xff]  ;;  %v485_v22 = vld [vmem:[%s3495_s3 + $0x68] sm:$0xff]  ;;  %s238_s6 = scalar_lea.vmem %s3493_s1, %s3505_s20  ;;  %vm330_vm12 = vcmask 31744  }
   0xd   : > { %s233_s24 = scalar_lea.vmem %s3492_s0, %s2067_s21  ;;  %2323 = vmatprep.subr.msk.mxu0 %vm355_vm6, %v323_v12  ;;  %2337 = vmatprep.subr.mxu1 %v487_v20  ;;  %v484_v23 = vld [vmem:[%s3495_s3 + $0x60] sm:$0xff]  ;;  %v483_v24 = vld [vmem:[%s3495_s3 + $0x58] sm:$0xff]  ;;  %v482_v25 = vld [vmem:[%s3495_s3 + $0x50] sm:$0xff]  ;;  %v2813_v33 = vshrl.u32 %v252_v32, 7  ;;  %v2815_v34 = vand.u32 127, %v252_v32  ;;  %s3507_s19 = smov (!%p240_p4, %s2736_s19), 2 }
   0xe   : > { %v2747_v1 = vld [vmem:[%s233_s24 + $0x10] sm:$0xff]  ;;  %v2749_v2 = vld [vmem:[%s233_s24] sm:$0xff]  ;;  %v2751_v3 = vld [vmem:[%s233_s24 + $0x18] sm:$0xff]  ;;  %2324 = vmatpush3.msk.msra.mxu0 %vm355_vm6, %v323_v12  ;;  %2338 = vmatpush3.msra.mxu1 %v487_v20  ;;  %v2698_v35 = vmov 1966171168  }
   0xf   : > { %vm258_vm0 = vcmp.gt.f32.partialorder %v2747_v1, 0.0  ;;  %vm256_vm1 = vcmp.gt.f32.partialorder %v2749_v2, 0.0  ;;  %vm259_vm2 = vcmp.gt.f32.partialorder %v2751_v3, 0.0  ;;  %v2756_v4 = vld [vmem:[%s233_s24 + $0x8] sm:$0xff]  ;;  %v2761_v9 = vld [vmem:[%s233_s24 + $0x20] sm:$0xff]  ;;  %v2768_v13 = vld [vmem:[%s233_s24 + $0x38] sm:$0xff]  ;;  %2381 = vmatprep.subr.mxu0 %v2697_v17  ;;  %2339 = vmatprep.subr.mxu1 %v486_v21  ;;  %v622_v36 = vunpack.c.l.s4 %v2698_v35 }
  0x10   : > { %v269_v6 = vsel %vm258_vm0, 1, %v2696_v5  ;;  %v267_v7 = vsel %vm256_vm1, 1, %v2696_v5  ;;  %vm257_vm3 = vcmp.gt.f32.partialorder %v2756_v4, 0.0  ;;  %v2759_v8 = vld [vmem:[%s233_s24 + $0x28] sm:$0xff]  ;;  %v270_v10 = vsel %vm259_vm2, 1, %v2696_v5  ;;  %v2770_v14 = vld [vmem:[%s233_s24 + $0x30] sm:$0xff]  ;;  %2340 = vmatpush3.msra.mxu1 %v486_v21 }
  0x11   : > { %282 = vperm.xlu1 %2619, %v269_v6   ;;  %276 = vperm.xlu0 %2618, %v267_v7   ;;  %v268_v11 = vsel %vm257_vm3, 1, %v2696_v5  ;;  %vm261_vm4 = vcmp.gt.f32.partialorder %v2759_v8, 0.0  ;;  %vm260_vm5 = vcmp.gt.f32.partialorder %v2761_v9, 0.0  ;;  %vm263_vm7 = vcmp.gt.f32.partialorder %v2768_v13, 0.0  ;;  %v481_v26 = vld [vmem:[%s3495_s3 + $0x48] sm:$0xff]  ;;  %v480_v27 = vld [vmem:[%s3495_s3 + $0x40] sm:$0xff] }
  0x12   : > { %v272_v15 = vsel %vm261_vm4, 1, %v2696_v5  ;;  %v271_v16 = vsel %vm260_vm5, 1, %v2696_v5  ;;  %vm262_vm8 = vcmp.gt.f32.partialorder %v2770_v14, 0.0  ;;  %v274_v18 = vsel %vm263_vm7, 1, %v2696_v5  ;;  %2341 = vmatprep.subr.mxu1 %v485_v22  ;;  %v479_v28 = vld [vmem:[%s3495_s3 + $0x38] sm:$0xff]  ;;  %v478_v29 = vld [vmem:[%s3495_s3 + $0x30] sm:$0xff] }
  0x13   : > { %v273_v19 = vsel %vm262_vm8, 1, %v2696_v5  ;;  %2342 = vmatpush3.msra.mxu1 %v485_v22  ;;  %v477_v30 = vld [vmem:[%s3495_s3 + $0x28] sm:$0xff]  ;;  %v476_v31 = vld [vmem:[%s3495_s3 + $0x20] sm:$0xff]  ;;  %vm264_vm9 = vcmp.eq.s32.totalorder %v2813_v33, 0  ;;  %vm265_vm10 = vcmp.ge.s32.totalorder %v2815_v34, 2  ;;  %v623_v38 = vunpack.c.0.s8 %v622_v36  ;;  %v2092_v21 = vld [vmem:[%s3495_s3 + $0xd8] sm:$0xff] }
  0x14   : > { %2343 = vmatprep.subr.mxu1 %v484_v23  ;;  %vm2823_vm11 = vmor %vm264_vm9, %vm265_vm10  ;;  %v597_v41 = vld [vmem:[%s238_s6] sm:$0x1]  ;;  %v598_v42 = vld [vmem:[%s238_s6 + $0x1] sm:$0x1] }
  0x15   : > { %285 = vperm.xlu1 %2619, %v270_v10   ;;  %279 = vperm.xlu0 %2618, %v268_v11   ;;  %v599_v43 = vld [vmem:[%s238_s6 + $0x2] sm:$0x1]  ;;  %v600_v44 = vld [vmem:[%s238_s6 + $0x3] sm:$0x1]  ;;  %v601_v45 = vld [vmem:[%s238_s6 + $0x4] sm:$0x1]  ;;  %v2830_v49 = vsub.s32 %v623_v38, %v2813_v33  ;;  %v617_v54 = vcombine.low %v597_v41, %v598_v42 }
  0x16   : > { %2344 = vmatpush3.msra.mxu1 %v484_v23  ;;  %v602_v46 = vld [vmem:[%s238_s6 + $0x5] sm:$0x1]  ;;  %v603_v47 = vld [vmem:[%s238_s6 + $0x6] sm:$0x1]  ;;  %v604_v48 = vld [vmem:[%s238_s6 + $0x7] sm:$0x1]  ;;  %v618_v55 = vcombine.low %v599_v43, %v600_v44 }
  0x17   : > { %2345 = vmatprep.subr.mxu1 %v483_v24  ;;  %v619_v56 = vcombine.low %v601_v45, %v602_v46  ;;  %v620_v57 = vcombine.low %v603_v47, %v604_v48  ;;  %v324_v59 = vld [vmem:[%s3494_s2 + $0x4] sm:$0xf]  ;;  %v627_v63 = vrot.slane %v617_v54, %v2830_v49  ;;  %v475_v22 = vld [vmem:[%s3495_s3 + $0x18] sm:$0xff]  ;;  %v2091_v23 = vld [vmem:[%s3495_s3 + $0xd0] sm:$0xff]  ;;  %s2069_s6 = sshll.u32 %s3507_s19, 3 }
  0x18   : > { %2346 = vmatpush3.msra.mxu1 %v483_v24  ;;  %v2093_v20 = vld [vmem:[%s3495_s3 + $0xe0] sm:$0xff]  ;;  %v474_v24 = vld [vmem:[%s3495_s3 + $0x10] sm:$0xff]  ;;  %v2084_v35 = vld [vmem:[%s3495_s3 + $0x98] sm:$0xff]  ;;  %s243_s8 = scalar_lea.vmem %s3497_s5, %s2069_s6 }
  0x19   : > { %291 = vperm.xlu1 %2619, %v272_v15   ;;  %288 = vperm.xlu0 %2618, %v271_v16   ;;  %v2085_v32 = vld [vmem:[%s3495_s3 + $0xa0] sm:$0xff]  ;;  %v2083_v36 = vld [vmem:[%s3495_s3 + $0x90] sm:$0xff]  ;;  %v2082_v37 = vld [vmem:[%s3495_s3 + $0x88] sm:$0xff] }
  0x1a   : > { %2347 = vmatprep.subr.mxu1 %v482_v25  ;;  %v2081_v38 = vld [vmem:[%s3495_s3 + $0x80] sm:$0xff]  ;;  %v2111_v54 = vld [vmem:[%s3495_s3 + $0x170] sm:$0xff] }
  0x1b   : > { %2348 = vmatpush3.msra.mxu1 %v482_v25  ;;  %v2090_v25 = vld [vmem:[%s3495_s3 + $0xc8] sm:$0xff]  ;;  %v2975_v41 = vld [vmem:[%s3496_s4] sm:$0xff] }
  0x1c   : > { %2349 = vmatprep.subr.mxu1 %v481_v26 }
  0x1d   : > { %297 = vperm.xlu1 %2619, %v274_v18   ;;  %294 = vperm.xlu0 %2618, %v273_v19  }
  0x1e   : > { %2350 = vmatpush3.msra.mxu1 %v481_v26  ;;  %v473_v26 = vld [vmem:[%s3495_s3 + $0x8] sm:$0xff] }
  0x1f   : > { %2351 = vmatprep.subr.mxu1 %v480_v27 }
  0x20   : > { %2352 = vmatpush3.msra.mxu1 %v480_v27  ;;  %v2089_v27 = vld [vmem:[%s3495_s3 + $0xc0] sm:$0xff] }
  0x21   : > { %2621 = vset.pattern.permute.xlu1 %v2696_v5  ;;  %2620 = vset.pattern.permute.xlu0 %v2696_v5  ;;  %v648_v5 = vrot.slane %v620_v57, %v2830_v49  ;;  %v2983_v57 = vsub.s32 2, %v2813_v33 }
  0x22   : > { %2353 = vmatprep.subr.mxu1 %v479_v28 }
  0x23   : > { %2354 = vmatpush3.msra.mxu1 %v479_v28  ;;  %v472_v28 = vld [vmem:[%s3495_s3] sm:$0xff] }
  0x24   : > { %2355 = vmatprep.subr.mxu1 %v478_v29 }
  0x25   : > { %2356 = vmatpush3.msra.mxu1 %v478_v29  ;;  %v2088_v29 = vld [vmem:[%s3495_s3 + $0xb8] sm:$0xff] }
  0x26   : > { %2357 = vmatprep.subr.mxu1 %v477_v30 }
  0x27   : > { %2358 = vmatpush3.msra.mxu1 %v477_v30  ;;  %v2087_v30 = vld [vmem:[%s3495_s3 + $0xb0] sm:$0xff] }
  0x28   : > { %2359 = vmatprep.subr.mxu1 %v476_v31 }
  0x29   : > { %2360 = vmatpush3.msra.mxu1 %v476_v31  ;;  %v2086_v31 = vld [vmem:[%s3495_s3 + $0xa8] sm:$0xff] }
  0x2a   : > { %2361 = vmatprep.subr.mxu1 %v475_v22 }
  0x2b   : > { %2362 = vmatpush3.msra.mxu1 %v475_v22  ;;  %v2103_v22 = vld [vmem:[%s3495_s3 + $0x130] sm:$0xff] }
  0x2c   : > { %2363 = vmatprep.subr.mxu1 %v474_v24 }
  0x2d   : > { %2364 = vmatpush3.msra.mxu1 %v474_v24  ;;  %v2102_v24 = vld [vmem:[%s3495_s3 + $0x128] sm:$0xff] }
  0x2e   : > { %2365 = vmatprep.subr.mxu1 %v473_v26 }
  0x2f   : > { %2366 = vmatpush3.msra.mxu1 %v473_v26  ;;  %v2101_v26 = vld [vmem:[%s3495_s3 + $0x120] sm:$0xff] }
  0x30   : > { %2367 = vmatprep.subr.mxu1 %v472_v28 }
  0x31   : > { %2368 = vmatpush3.msra.mxu1 %v472_v28  ;;  %v2100_v28 = vld [vmem:[%s3495_s3 + $0x118] sm:$0xff] }
  0x8c   : > { %v283_v39 = vpop.permute.xlu1 %282  ;;  %v277_v40 = vpop.permute.xlu0 %276 }
  0x8d   : > { %vm301_vm13 = vcmp.eq.s32.totalorder %v283_v39, 1  ;;  %vm299_vm14 = vcmp.eq.s32.totalorder %v277_v40, 1  ;;  %v2112_v39 = vld [vmem:[%s3495_s3 + $0x178] sm:$0xff]  ;;  %v2970_v40 = vsub.s32 0, %v2813_v33 }
  0x8e   : > { %vm307_vm15 = vmor %vm2823_vm11, %vm299_vm14  ;;  %2421 = vmatprep.subr.mxu1 %v2112_v39 }
  0x8f   : > { %vm2834_vm0 = vmor %vm2823_vm11, %vm301_vm13  ;;  %v315_v52 = vsel %vm307_vm15, %v2749_v2, 0.0  ;;  %v641_v2 = vrot.slane %v619_v56, %v2830_v49  ;;  %vm2699_vm15 = vmmov 0   ;;  %v329_v42 = vrot.slane %v2975_v41, %v2970_v40 }
  0x90   : > { %v286_v51 = vpop.permute.xlu1 %285  ;;  %v280_v53 = vpop.permute.xlu0 %279  ;;  %2325 = vmatprep.mubr.msk.f32.mxu0 %vm330_vm12, %v315_v52  ;;  %v317_v58 = vsel %vm2834_vm0, %v2747_v1, 0.0  ;;  %v634_v1 = vrot.slane %v618_v55, %v2830_v49  ;;  %vm1220_vm0 = vcmask 1043459  }
  0x91   : > { %vm300_vm1 = vcmp.eq.s32.totalorder %v280_v53, 1  ;;  %vm302_vm2 = vcmp.eq.s32.totalorder %v286_v51, 1  ;;  %v650_v12 = vcombine.low %v641_v2, %v648_v5  ;;  %v608_v2 = vrot.slane %v2975_v41, %v2983_v57  ;;  %v2108_v5 = vld [vmem:[%s3495_s3 + $0x158] sm:$0xff] }
  0x92   : > { %vm308_vm3 = vmor %vm2823_vm11, %vm300_vm1  ;;  %v649_v11 = vcombine.low %v627_v63, %v634_v1  ;;  %v2109_v63 = vld [vmem:[%s3495_s3 + $0x160] sm:$0xff]  ;;  %vm1222_vm1 = vcmask 1044484  }
  0x93   : > { %v316_v60 = vsel %vm308_vm3, %v2756_v4, 0.0  ;;  %vm2852_vm4 = vmor %vm2823_vm11, %vm302_vm2  ;;  %v664_v16 = vrot.slane %v650_v12, %v2830_v49  ;;  %vm1224_vm2 = vcmask 1045509   ;;  %vm1226_vm3 = vcmask 1046534  }
  0x94   : > { %v292_v61 = vpop.permute.xlu1 %291  ;;  %v289_v62 = vpop.permute.xlu0 %288  ;;  %2326 = vmatmul.mubr.msk.f32.vlgmr.msra.gmra.mxu0 %vm330_vm12, %v316_v60  ;;  %v318_v4 = vsel %vm2852_vm4, %v2751_v3, 0.0  ;;  %v657_v15 = vrot.slane %v649_v11, %v2830_v49  ;;  %v2107_v11 = vld [vmem:[%s3495_s3 + $0x150] sm:$0xff]  ;;  %vm1228_vm4 = vcmask 1047559  }
  0x95   : > { %vm303_vm5 = vcmp.eq.s32.totalorder %v289_v62, 1  ;;  %vm304_vm7 = vcmp.eq.s32.totalorder %v292_v61, 1  ;;  %2382 = vmatpush3.msk.msra.mxu0 %vm355_vm6, %v324_v59  ;;  %2328 = vmatprep.mubr.msk.f32.mxu0 %vm330_vm12, %v317_v58  ;;  %v2110_v58 = vld [vmem:[%s3495_s3 + $0x168] sm:$0xff] }
  0x96   : > { %vm311_vm8 = vmor %vm2823_vm11, %vm303_vm5  ;;  %2386 = vmatprep.subr.mxu0 %v2697_v17  ;;  %v665_v19 = vcombine.low %v657_v15, %v664_v16  ;;  %v2106_v15 = vld [vmem:[%s3495_s3 + $0x148] sm:$0xff]  ;;  %vm1231_vm5 = vcmask 64512  }
  0x97   : > { %v319_v6 = vsel %vm311_vm8, %v2761_v9, 0.0  ;;  %vm312_vm9 = vmor %vm2823_vm11, %vm304_vm7 }
  0x98   : > { %v298_v7 = vpop.permute.xlu1 %297  ;;  %v295_v10 = vpop.permute.xlu0 %294  ;;  %2329 = vmatmul.mubr.msk.f32.gmra.mxu0 %vm330_vm12, %v318_v4  ;;  %v320_v3 = vsel %vm312_vm9, %v2759_v8, 0.0  ;;  %v2096_v8 = vld [vmem:[%s3495_s3 + $0xf8] sm:$0xff] }
  0x99   : > { %vm305_vm6 = vcmp.eq.s32.totalorder %v295_v10, 1  ;;  %vm306_vm10 = vcmp.eq.s32.totalorder %v298_v7, 1  ;;  %2331 = vmatprep.mubr.msk.f32.mxu0 %vm330_vm12, %v319_v6 }
  0x9a   : > { %vm313_vm13 = vmor %vm2823_vm11, %vm305_vm6 }
  0x9b   : > { %v321_v9 = vsel %vm313_vm13, %v2770_v14, 0.0  ;;  %vm314_vm14 = vmor %vm2823_vm11, %vm306_vm10  ;;  %v2095_v14 = vld [vmem:[%s3495_s3 + $0xf0] sm:$0xff]  ;;  %vm1216_vm11 = vcmask 1041409  }
  0x9c   : > { %2332 = vmatmul.mubr.msk.f32.gmra.mxu0 %vm330_vm12, %v320_v3  ;;  %v322_v18 = vsel %vm314_vm14, %v2768_v13, 0.0  ;;  %v2094_v13 = vld [vmem:[%s3495_s3 + $0xe8] sm:$0xff] }
  0x9d   : > { %2334 = vmatprep.mubr.msk.f32.mxu0 %vm330_vm12, %v321_v9 }
  0xa0   : > { %2335 = vmatmul.mubr.msk.f32.gmra.mxu0 %vm330_vm12, %v322_v18 }
  0xa1   : > { %2383 = vmatprep.mubr.msk.f32.mxu0 %vm2699_vm15, %v2697_v17 }
  0xa4   : > { %2384 = vmatmul.mubr.msk.f32.vlgmr.msra.gmra.mxu0 %vm330_vm12, %v665_v19  ;;  %vm1218_vm12 = vcmask 1042434  }
  0xa5   : > { %2387 = vmatpush3.msra.mxu0 %v2096_v8  ;;  %2418 = vmatprep.mubr.msk.f32.mxu0 %vm2699_vm15, %v2697_v17  ;;  %v2128_v8 = vld [vmem:[%s3495_s3 + $0x1f8] sm:$0xff] }
  0xa6   : > { %2388 = vmatprep.subr.mxu0 %v2697_v17 }
  0xa7   : > { %2389 = vmatpush3.msra.mxu0 %v2095_v14  ;;  %v2105_v14 = vld [vmem:[%s3495_s3 + $0x140] sm:$0xff] }
  0xa8   : > { %2390 = vmatprep.subr.mxu0 %v2697_v17 }
  0xa9   : > { %2391 = vmatpush3.msra.mxu0 %v2094_v13  ;;  %v2127_v13 = vld [vmem:[%s3495_s3 + $0x1f0] sm:$0xff] }
  0xaa   : > { %2392 = vmatprep.subr.mxu0 %v2697_v17 }
  0xab   : > { %2393 = vmatpush3.msra.mxu0 %v2093_v20  ;;  %v2104_v20 = vld [vmem:[%s3495_s3 + $0x138] sm:$0xff] }
  0xac   : > { %2394 = vmatprep.subr.mxu0 %v2697_v17 }
  0xad   : > { %2395 = vmatpush3.msra.mxu0 %v2092_v21  ;;  %v2126_v21 = vld [vmem:[%s3495_s3 + $0x1e8] sm:$0xff] }
  0xae   : > { %2396 = vmatprep.subr.mxu0 %v2697_v17 }
  0xaf   : > { %2397 = vmatpush3.msra.mxu0 %v2091_v23  ;;  %v2125_v23 = vld [vmem:[%s3495_s3 + $0x1e0] sm:$0xff] }
  0xb0   : > { %2398 = vmatprep.subr.mxu0 %v2697_v17 }
  0xb1   : > { %2399 = vmatpush3.msra.mxu0 %v2090_v25  ;;  %v2124_v25 = vld [vmem:[%s3495_s3 + $0x1d8] sm:$0xff] }
  0xb2   : > { %2400 = vmatprep.subr.mxu0 %v2697_v17 }
  0xb3   : > { %2401 = vmatpush3.msra.mxu0 %v2089_v27  ;;  %v2123_v27 = vld [vmem:[%s3495_s3 + $0x1d0] sm:$0xff] }
  0xb4   : > { %2402 = vmatprep.subr.mxu0 %v2697_v17 }
  0xb5   : > { %2403 = vmatpush3.msra.mxu0 %v2088_v29  ;;  %v2122_v29 = vld [vmem:[%s3495_s3 + $0x1c8] sm:$0xff] }
  0xb6   : > { %2404 = vmatprep.subr.mxu0 %v2697_v17 }
  0xb7   : > { %2405 = vmatpush3.msra.mxu0 %v2087_v30  ;;  %v2121_v30 = vld [vmem:[%s3495_s3 + $0x1c0] sm:$0xff] }
  0xb8   : > { %2406 = vmatprep.subr.mxu0 %v2697_v17 }
  0xb9   : > { %2407 = vmatpush3.msra.mxu0 %v2086_v31  ;;  %v2099_v31 = vld [vmem:[%s3495_s3 + $0x110] sm:$0xff] }
  0xba   : > { %2408 = vmatprep.subr.mxu0 %v2697_v17 }
  0xbb   : > { %2409 = vmatpush3.msra.mxu0 %v2085_v32  ;;  %v2120_v32 = vld [vmem:[%s3495_s3 + $0x1b8] sm:$0xff] }
  0xbc   : > { %2410 = vmatprep.subr.mxu0 %v2697_v17 }
  0xbd   : > { %2411 = vmatpush3.msra.mxu0 %v2084_v35  ;;  %v2098_v35 = vld [vmem:[%s3495_s3 + $0x108] sm:$0xff] }
  0xbe   : > { %2412 = vmatprep.subr.mxu0 %v2697_v17 }
  0xbf   : > { %2413 = vmatpush3.msra.mxu0 %v2083_v36  ;;  %v2119_v36 = vld [vmem:[%s3495_s3 + $0x1b0] sm:$0xff] }
  0xc0   : > { %2414 = vmatprep.subr.mxu0 %v2697_v17 }
  0xc1   : > { %2415 = vmatpush3.msra.mxu0 %v2082_v37  ;;  %v2097_v37 = vld [vmem:[%s3495_s3 + $0x100] sm:$0xff] }
  0xc2   : > { %2416 = vmatprep.subr.mxu0 %v2697_v17 }
  0xc3   : > { %2417 = vmatpush3.msra.mxu0 %v2081_v38  ;;  %v2118_v38 = vld [vmem:[%s3495_s3 + $0x1a8] sm:$0xff] }
  0xc4   : > { %2465 = vmatprep.subr.mxu0 %v2697_v17 }
 0x154   : > { %v2327_v43 = vpop.f32.mrf.mxu0 }
 0x155   : > { %v431_v44 = vadd.f32 %v2327_v43, %v329_v42  ;;  %v2115_v43 = vld [vmem:[%s3495_s3 + $0x190] sm:$0xff] }
 0x156   : > { %v425_v45 = vpop.f32.mrf.mxu0 }
 0x157   : > { %v426_v46 = vadd.f32 %v425_v45, %v329_v42  ;;  %v465_v50 = vmax.f32 %v431_v44, 0.0  ;;  %v2114_v44 = vld [vmem:[%s3495_s3 + $0x188] sm:$0xff]  ;;  %v2113_v45 = vld [vmem:[%s3495_s3 + $0x180] sm:$0xff] }
 0x158   : > { %v2330_v47 = vpop.f32.mrf.mxu0 }
 0x159   : > { %v464_v48 = vmax.f32 %v426_v46, 0.0  ;;  %v441_v51 = vadd.f32 %v2330_v47, %v329_v42  ;;  %v3097_v46 = vsub.s32 1, %v2813_v33 }
 0x15a   : > { %v435_v52 = vpop.f32.mrf.mxu0 }
 0x15b   : > { %v436_v53 = vadd.f32 %v435_v52, %v329_v42  ;;  %2369 = vmatprep.mubr.f32.mxu1 %v464_v48  ;;  %v467_v59 = vmax.f32 %v441_v51, 0.0  ;;  %v491_v47 = vrot.slane %v2975_v41, %v3097_v46 }
 0x15c   : > { %v2333_v55 = vpop.f32.mrf.mxu0  ;;  %2370 = vmatmul.mubr.f32.vlgmr.msra.gmra.mxu1 %v465_v50 }
 0x15d   : > { %v466_v56 = vmax.f32 %v436_v53, 0.0  ;;  %2422 = vmatpush3.msra.mxu1 %v2112_v39  ;;  %v451_v60 = vadd.f32 %v2333_v55, %v329_v42  ;;  %v2117_v39 = vld [vmem:[%s3495_s3 + $0x1a0] sm:$0xff]  ;;  %v3108_v55 = vsub.s32 3, %v2813_v33 }
 0x15e   : > { %v445_v61 = vpop.f32.mrf.mxu0  ;;  %2423 = vmatprep.subr.mxu1 %v2111_v54 }
 0x15f   : > { %v446_v62 = vadd.f32 %v445_v61, %v329_v42  ;;  %2372 = vmatprep.mubr.f32.mxu1 %v466_v56  ;;  %2424 = vmatpush3.msra.mxu1 %v2111_v54  ;;  %v469_v4 = vmax.f32 %v451_v60, 0.0  ;;  %v762_v61 = vrot.slane %v2975_v41, %v3108_v55 }
 0x160   : > { %v2336_v0 = vpop.f32.mrf.mxu0  ;;  %2373 = vmatmul.mubr.f32.gmra.mxu1 %v467_v59  ;;  %2425 = vmatprep.subr.mxu1 %v2110_v58 }
 0x161   : > { %v468_v1 = vmax.f32 %v446_v62, 0.0  ;;  %2426 = vmatpush3.msra.mxu1 %v2110_v58  ;;  %v461_v6 = vadd.f32 %v2336_v0, %v329_v42 }
 0x162   : > { %v455_v7 = vpop.f32.mrf.mxu0  ;;  %2427 = vmatprep.subr.mxu1 %v2109_v63 }
 0x163   : > { %v456_v10 = vadd.f32 %v455_v7, %v329_v42  ;;  %2375 = vmatprep.mubr.f32.mxu1 %v468_v1  ;;  %2428 = vmatpush3.msra.mxu1 %v2109_v63  ;;  %v471_v16 = vmax.f32 %v461_v6, 0.0  ;;  %v2116_v42 = vld [vmem:[%s3495_s3 + $0x198] sm:$0xff] }
 0x164   : > { %2376 = vmatmul.mubr.f32.gmra.mxu1 %v469_v4  ;;  %v737_v12 = vpop.f32.mrf.mxu0  ;;  %2429 = vmatprep.subr.mxu1 %v2108_v5  ;;  %v2144_v4 = vld [vmem:[%s3495_s3 + $0x278] sm:$0xff] }
 0x165   : > { %v470_v3 = vmax.f32 %v456_v10, 0.0  ;;  %v738_v9 = vadd.f32 %v737_v12, %v608_v2  ;;  %2430 = vmatpush3.msra.mxu1 %v2108_v5  ;;  %v2142_v12 = vld [vmem:[%s3495_s3 + $0x268] sm:$0xff] }
 0x166   : > { %v2385_v18 = vpop.f32.mrf.mxu0  ;;  %2431 = vmatprep.subr.mxu1 %v2107_v11 }
 0x167   : > { %v741_v19 = vmax.f32 %v738_v9, 0.0  ;;  %2378 = vmatprep.mubr.f32.mxu1 %v470_v3  ;;  %2432 = vmatpush3.msra.mxu1 %v2107_v11  ;;  %v2143_v11 = vld [vmem:[%s3495_s3 + $0x270] sm:$0xff]  ;;  %v2141_v3 = vld [vmem:[%s3495_s3 + $0x260] sm:$0xff]  ;;  %v2140_v9 = vld [vmem:[%s3495_s3 + $0x258] sm:$0xff] }
 0x168   : > { %2379 = vmatmul.mubr.f32.gmra.mxu1 %v471_v16  ;;  %2433 = vmatprep.subr.mxu1 %v2106_v15  ;;  %v2138_v16 = vld [vmem:[%s3495_s3 + $0x248] sm:$0xff]  ;;  %v2137_v18 = vld [vmem:[%s3495_s3 + $0x240] sm:$0xff] }
 0x169   : > { %2419 = vmatmul.mubr.f32.vlgmr.msra.gmra.mxu0 %v741_v19  ;;  %2434 = vmatpush3.msra.mxu1 %v2106_v15  ;;  %v2139_v15 = vld [vmem:[%s3495_s3 + $0x250] sm:$0xff]  ;;  %v2136_v19 = vld [vmem:[%s3495_s3 + $0x238] sm:$0xff] }
 0x16a   : > { %2466 = vmatpush3.msra.mxu0 %v2128_v8  ;;  %2435 = vmatprep.subr.mxu1 %v2105_v14  ;;  %v2135_v8 = vld [vmem:[%s3495_s3 + $0x230] sm:$0xff] }
 0x16b   : > { %2467 = vmatprep.subr.mxu0 %v2697_v17  ;;  %2436 = vmatpush3.msra.mxu1 %v2105_v14  ;;  %v2134_v14 = vld [vmem:[%s3495_s3 + $0x228] sm:$0xff] }
 0x16c   : > { %2468 = vmatpush3.msra.mxu0 %v2127_v13  ;;  %2437 = vmatprep.subr.mxu1 %v2104_v20  ;;  %v2133_v13 = vld [vmem:[%s3495_s3 + $0x220] sm:$0xff] }
 0x16d   : > { %2469 = vmatprep.subr.mxu0 %v2697_v17  ;;  %2438 = vmatpush3.msra.mxu1 %v2104_v20  ;;  %v2132_v20 = vld [vmem:[%s3495_s3 + $0x218] sm:$0xff] }
 0x16e   : > { %2470 = vmatpush3.msra.mxu0 %v2126_v21  ;;  %2439 = vmatprep.subr.mxu1 %v2103_v22  ;;  %v2131_v21 = vld [vmem:[%s3495_s3 + $0x210] sm:$0xff] }
 0x16f   : > { %2471 = vmatprep.subr.mxu0 %v2697_v17  ;;  %2440 = vmatpush3.msra.mxu1 %v2103_v22  ;;  %v2130_v22 = vld [vmem:[%s3495_s3 + $0x208] sm:$0xff] }
 0x170   : > { %2472 = vmatpush3.msra.mxu0 %v2125_v23  ;;  %2441 = vmatprep.subr.mxu1 %v2102_v24  ;;  %v2129_v23 = vld [vmem:[%s3495_s3 + $0x200] sm:$0xff] }
 0x171   : > { %2473 = vmatprep.subr.mxu0 %v2697_v17  ;;  %2442 = vmatpush3.msra.mxu1 %v2102_v24 }
 0x172   : > { %2474 = vmatpush3.msra.mxu0 %v2124_v25  ;;  %2443 = vmatprep.subr.mxu1 %v2101_v26 }
 0x173   : > { %2475 = vmatprep.subr.mxu0 %v2697_v17  ;;  %2444 = vmatpush3.msra.mxu1 %v2101_v26 }
 0x174   : > { %2476 = vmatpush3.msra.mxu0 %v2123_v27  ;;  %2445 = vmatprep.subr.mxu1 %v2100_v28 }
 0x175   : > { %2477 = vmatprep.subr.mxu0 %v2697_v17  ;;  %2446 = vmatpush3.msra.mxu1 %v2100_v28 }
 0x176   : > { %2478 = vmatpush3.msra.mxu0 %v2122_v29  ;;  %2497 = vmatprep.mubr.msk.f32.mxu0 %vm2699_vm15, %v2697_v17 }
 0x177   : > { %2479 = vmatprep.subr.mxu0 %v2697_v17  ;;  %2447 = vmatprep.subr.mxu1 %v2099_v31 }
 0x178   : > { %2480 = vmatpush3.msra.mxu0 %v2121_v30  ;;  %2448 = vmatpush3.msra.mxu1 %v2099_v31 }
 0x179   : > { %2481 = vmatprep.subr.mxu0 %v2697_v17  ;;  %2449 = vmatprep.subr.mxu1 %v2098_v35 }
 0x17a   : > { %2482 = vmatpush3.msra.mxu0 %v2120_v32  ;;  %2450 = vmatpush3.msra.mxu1 %v2098_v35 }
 0x17b   : > { %2483 = vmatprep.subr.mxu0 %v2697_v17  ;;  %2451 = vmatprep.subr.mxu1 %v2097_v37 }
 0x17c   : > { %2484 = vmatpush3.msra.mxu0 %v2119_v36  ;;  %2452 = vmatpush3.msra.mxu1 %v2097_v37 }
 0x17d   : > { %2485 = vmatprep.subr.mxu0 %v2697_v17  ;;  %2500 = vmatprep.subr.mxu1 %v2697_v17 }
 0x17e   : > { %2486 = vmatpush3.msra.mxu0 %v2118_v38 }
 0x17f   : > { %2487 = vmatprep.subr.mxu0 %v2697_v17 }
 0x180   : > { %2488 = vmatpush3.msra.mxu0 %v2117_v39 }
 0x181   : > { %2489 = vmatprep.subr.mxu0 %v2697_v17 }
 0x182   : > { %2490 = vmatpush3.msra.mxu0 %v2116_v42 }
 0x183   : > { %2491 = vmatprep.subr.mxu0 %v2697_v17 }
 0x184   : > { %2492 = vmatpush3.msra.mxu0 %v2115_v43 }
 0x185   : > { %2493 = vmatprep.subr.mxu0 %v2697_v17 }
 0x186   : > { %2494 = vmatpush3.msra.mxu0 %v2114_v44 }
 0x187   : > { %2495 = vmatprep.subr.mxu0 %v2697_v17 }
 0x188   : > { %2496 = vmatpush3.msra.mxu0 %v2113_v45 }
 0x189   : > { %2535 = vmatprep.subr.mxu0 %v2697_v17 }
 0x21c   : > { %v2371_v48 = vpop.f32.mrf.mxu1 }
 0x21d   : > { %v3103_v52 = vadd.f32 %v2371_v48, %v491_v47 }
 0x21e   : > { %v558_v50 = vpop.f32.mrf.mxu1 }
 0x21f   : > { %v3101_v51 = vadd.f32 %v558_v50, %v491_v47 }
 0x220   : > { %v2374_v53 = vpop.f32.mrf.mxu1 }
 0x221   : > { %2453 = vmatprep.mubr.f32.mxu1 %v3101_v51  ;;  %v3112_v58 = vadd.f32 %v2374_v53, %v491_v47 }
 0x222   : > { %v568_v54 = vpop.f32.mrf.mxu1  ;;  %2454 = vmatmul.mubr.f32.vlgmr.msra.gmra.mxu1 %v3103_v52 }
 0x223   : > { %v3110_v56 = vadd.f32 %v568_v54, %v491_v47 }
 0x224   : > { %v2377_v59 = vpop.f32.mrf.mxu1 }
 0x225   : > { %2456 = vmatprep.mubr.f32.mxu1 %v3110_v56  ;;  %v3120_v63 = vadd.f32 %v2377_v59, %v491_v47 }
 0x226   : > { %v578_v60 = vpop.f32.mrf.mxu1  ;;  %2457 = vmatmul.mubr.f32.gmra.mxu1 %v3112_v58 }
 0x227   : > { %v3118_v62 = vadd.f32 %v578_v60, %v491_v47 }
 0x228   : > { %v2380_v0 = vpop.f32.mrf.mxu1 }
 0x229   : > { %v829_v1 = vpop.f32.mrf.mxu0  ;;  %2459 = vmatprep.mubr.f32.mxu1 %v3118_v62  ;;  %v3129_v10 = vadd.f32 %v2380_v0, %v491_v47 }
 0x22a   : > { %v830_v2 = vadd.f32 %v829_v1, %v762_v61  ;;  %v588_v5 = vpop.f32.mrf.mxu1  ;;  %2460 = vmatmul.mubr.f32.gmra.mxu1 %v3120_v63 }
 0x22b   : > { %v3127_v6 = vadd.f32 %v588_v5, %v491_v47  ;;  %v2420_v7 = vpop.f32.mrf.mxu0 }
 0x22c   : > { %2498 = vmatmul.mubr.f32.vlgmr.msra.gmra.mxu0 %v830_v2 }
 0x22d   : > { %2536 = vmatpush3.msra.mxu0 %v2144_v4  ;;  %2462 = vmatprep.mubr.f32.mxu1 %v3127_v6 }
 0x22e   : > { %2537 = vmatprep.subr.mxu0 %v2697_v17  ;;  %2463 = vmatmul.mubr.f32.gmra.mxu1 %v3129_v10 }
 0x22f   : > { %2538 = vmatpush3.msra.mxu0 %v2143_v11  ;;  %2567 = vmatprep.mubr.msk.f32.mxu0 %vm2699_vm15, %v2697_v17 }
 0x230   : > { %2539 = vmatprep.subr.mxu0 %v2697_v17  ;;  %2532 = vmatprep.mubr.msk.f32.mxu1 %vm2699_vm15, %v2697_v17 }
 0x231   : > { %2540 = vmatpush3.msra.mxu0 %v2142_v12 }
 0x232   : > { %2541 = vmatprep.subr.mxu0 %v2697_v17 }
 0x233   : > { %2542 = vmatpush3.msra.mxu0 %v2141_v3 }
 0x234   : > { %2543 = vmatprep.subr.mxu0 %v2697_v17 }
 0x235   : > { %2544 = vmatpush3.msra.mxu0 %v2140_v9 }
 0x236   : > { %2545 = vmatprep.subr.mxu0 %v2697_v17 }
 0x237   : > { %2546 = vmatpush3.msra.mxu0 %v2139_v15 }
 0x238   : > { %2547 = vmatprep.subr.mxu0 %v2697_v17 }
 0x239   : > { %2548 = vmatpush3.msra.mxu0 %v2138_v16 }
 0x23a   : > { %2549 = vmatprep.subr.mxu0 %v2697_v17 }
 0x23b   : > { %2550 = vmatpush3.msra.mxu0 %v2137_v18  ;;  %v3212_v18 = vsub.s32 6, %v2813_v33 }
 0x23c   : > { %2551 = vmatprep.subr.mxu0 %v2697_v17 }
 0x23d   : > { %2552 = vmatpush3.msra.mxu0 %v2136_v19 }
 0x23e   : > { %2553 = vmatprep.subr.mxu0 %v2697_v17 }
 0x23f   : > { %2554 = vmatpush3.msra.mxu0 %v2135_v8  ;;  %v1151_v8 = vrot.slane %v2975_v41, %v3212_v18 }
 0x240   : > { %2555 = vmatprep.subr.mxu0 %v2697_v17 }
 0x241   : > { %2556 = vmatpush3.msra.mxu0 %v2134_v14 }
 0x242   : > { %2557 = vmatprep.subr.mxu0 %v2697_v17 }
 0x243   : > { %2558 = vmatpush3.msra.mxu0 %v2133_v13 }
 0x244   : > { %2559 = vmatprep.subr.mxu0 %v2697_v17 }
 0x245   : > { %2560 = vmatpush3.msra.mxu0 %v2132_v20 }
 0x246   : > { %2561 = vmatprep.subr.mxu0 %v2697_v17 }
 0x247   : > { %2562 = vmatpush3.msra.mxu0 %v2131_v21 }
 0x248   : > { %2563 = vmatprep.subr.mxu0 %v2697_v17 }
 0x249   : > { %2564 = vmatpush3.msra.mxu0 %v2130_v22 }
 0x24a   : > { %2565 = vmatprep.subr.mxu0 %v2697_v17 }
 0x24b   : > { %2566 = vmatpush3.msra.mxu0 %v2129_v23 }
 0x24c   : > { %2568 = vmatmul.mubr.f32.vlgmr.msra.gmra.mxu0 %v830_v2 }
 0x2e2   : > { %v2455_v24 = vpop.f32.mrf.mxu1 }
 0x2e4   : > { %v916_v25 = vpop.f32.mrf.mxu1 }
 0x2e6   : > { %v2458_v26 = vpop.f32.mrf.mxu1 }
 0x2e8   : > { %v926_v27 = vpop.f32.mrf.mxu1 }
 0x2ea   : > { %v2461_v28 = vpop.f32.mrf.mxu1 }
 0x2ec   : > { %v1038_v29 = vpop.f32.mrf.mxu0  ;;  %v936_v38 = vpop.f32.mrf.mxu1 }
 0x2ed   : > { %v1043_v30 = vcombine.high %v1038_v29, %v1038_v29  ;;  %v1050_v31 = vrot.slane %v1038_v29, %v2830_v49 }
 0x2ee   : > { %v2499_v32 = vpop.f32.mrf.mxu0  ;;  %v2464_v59 = vpop.f32.mrf.mxu1 }
 0x2ef   : > { %v1057_v35 = vrot.slane %v1043_v30, %v2830_v49  ;;  %v1058_v36 = vcombine.high %v1050_v31, %v1050_v31  ;;  %v1066_v37 = vrot.slane %v1050_v31, %v2830_v49 }
 0x2f0   : > { %v946_v3 = vpop.f32.mrf.mxu1 }
 0x2f1   : > { %v1059_v39 = vcombine.high %v1057_v35, %v1057_v35  ;;  %v1073_v42 = vrot.slane %v1057_v35, %v2830_v49  ;;  %v1080_v43 = vrot.slane %v1058_v36, %v2830_v49  ;;  %v1088_v44 = vcombine.high %v1066_v37, %v1066_v37 }
 0x2f2   : > { %v1095_v45 = vrot.slane %v1066_v37, %v2970_v40 }
 0x2f3   : > { %v1090_v47 = vcombine.high %v1080_v43, %v1080_v43  ;;  %v1099_v48 = vrot.slane %v1080_v43, %v2970_v40  ;;  %v1103_v50 = vrot.slane %v1088_v44, %v2970_v40  ;;  %v1111_v53 = vrot.slane %v1073_v42, %v2970_v40 }
 0x2f4   : > { %v1132_v54 = vadd.f32 %v1095_v45, %v916_v25  ;;  %v1087_v60 = vrot.slane %v1059_v39, %v2830_v49  ;;  %v1089_v61 = vcombine.high %v1073_v42, %v1073_v42 }
 0x2f5   : > { %v1107_v0 = vrot.slane %v1090_v47, %v2970_v40  ;;  %v1133_v1 = vadd.f32 %v2455_v24, %v1099_v48  ;;  %v1134_v2 = vadd.f32 %v1103_v50, %v926_v27  ;;  %v1136_v5 = vadd.f32 %v1111_v53, %v936_v38 }
 0x2f6   : > { %2622 = vtanh.f32 %v1132_v54  ;;  %v1119_v4 = vrot.slane %v1089_v61, %v2970_v40  ;;  %v1091_v11 = vcombine.high %v1087_v60, %v1087_v60  ;;  %v1115_v12 = vrot.slane %v1087_v60, %v2970_v40 }
 0x2f7   : > { %2624 = vtanh.f32 %v1133_v1  ;;  %v1135_v7 = vadd.f32 %v2458_v26, %v1107_v0  ;;  %v3220_v38 = vsub.s32 %v2815_v34, %v2813_v33 }
 0x2f8   : > { %2626 = vtanh.f32 %v1134_v2  ;;  %v1138_v9 = vadd.f32 %v1119_v4, %v946_v3  ;;  %v1123_v15 = vrot.slane %v1091_v11, %v2970_v40  ;;  %v1137_v16 = vadd.f32 %v2461_v28, %v1115_v12 }
 0x2f9   : > { %2628 = vtanh.f32 %v1136_v5 }
 0x2fa   : > { %2630 = vtanh.f32 %v1135_v7  ;;  %v1139_v19 = vadd.f32 %v2464_v59, %v1123_v15 }
 0x2fb   : > { %2632 = vtanh.f32 %v1138_v9 }
 0x2fc   : > { %2634 = vtanh.f32 %v1137_v16 }
 0x2fd   : > { %2636 = vtanh.f32 %v1139_v19 }
 0x303   : > { %v2623_v14 = vpop.eup %2622 }
 0x304   : > { %v2625_v13 = vpop.eup %2624  ;;  %v1152_v20 = vmul.f32 %v2623_v14, %v1151_v8 }
 0x305   : > { %v2627_v21 = vpop.eup %2626  ;;  %v1153_v22 = vmul.f32 %v2625_v13, %v1151_v8  ;;  %v3242_v13 = vsub.s32 4, %v2813_v33 }
 0x306   : > { %1160 = vadd.xlane.f32.xlu0 %v1152_v20  ;;  %v2629_v23 = vpop.eup %2628  ;;  %v1154_v24 = vmul.f32 %v2627_v21, %v1151_v8 }
 0x307   : > { %1162 = vadd.xlane.f32.xlu1 %v1153_v22  ;;  %v2631_v25 = vpop.eup %2630  ;;  %v1156_v26 = vmul.f32 %v2629_v23, %v1151_v8 }
 0x308   : > { %v2633_v27 = vpop.eup %2632  ;;  %v1155_v29 = vmul.f32 %v2631_v25, %v1151_v8 }
 0x309   : > { %v2635_v30 = vpop.eup %2634  ;;  %v1158_v41 = vmul.f32 %v2633_v27, %v1151_v8 }
 0x30a   : > { %1164 = vadd.xlane.f32.xlu0 %v1154_v24  ;;  %v1157_v32 = vmul.f32 %v2635_v30, %v1151_v8  ;;  %v2637_v35 = vpop.eup %2636  ;;  %v3246_v24 = vsub.s32 5, %v2813_v33 }
 0x30b   : > { %1168 = vadd.xlane.f32.xlu1 %v1156_v26  ;;  %v1159_v36 = vmul.f32 %v2637_v35, %v1151_v8 }
 0x30c   : > { %v3216_v28 = vpop.f32.mrf.mxu0 }
 0x30e   : > { %v2569_v31 = vpop.f32.mrf.mxu0  ;;  %1166 = vadd.xlane.f32.xlu0 %v1155_v29 }
 0x30f   : > { %1172 = vadd.xlane.f32.xlu1 %v1158_v41  ;;  %v3251_v31 = vsub.s32 7, %v2813_v33 }
 0x312   : > { %1170 = vadd.xlane.f32.xlu0 %v1157_v32 }
 0x316   : > { %1174 = vadd.xlane.f32.xlu0 %v1159_v36 }
 0x38f   : > { %v1161_v37 = vpop.xlane.xlu0 %1160 }
 0x390   : > { %v1163_v39 = vpop.xlane.xlu1 %1162  ;;  %v1187_v44 = vrot.slane %v1161_v37, %v3220_v38 }
 0x391   : > { %v1191_v42 = vrot.slane %v1163_v39, %v3220_v38 }
 0x393   : > { %v1165_v43 = vpop.xlane.xlu0 %1164  ;;  %v1217_v47 = vsel %vm1216_vm11, %v1191_v42, %v1187_v44 }
 0x394   : > { %v1195_v45 = vrot.slane %v1165_v43, %v3220_v38  ;;  %v1169_v48 = vpop.xlane.xlu1 %1168 }
 0x395   : > { %v1203_v59 = vrot.slane %v1169_v48, %v3220_v38 }
 0x396   : > { %v1219_v34 = vsel %vm1218_vm12, %v1195_v45, %v1217_v47 }
 0x397   : > { %v1167_v50 = vpop.xlane.xlu0 %1166 }
 0x398   : > { %v1199_v53 = vrot.slane %v1167_v50, %v3220_v38  ;;  %v1173_v61 = vpop.xlane.xlu1 %1172 }
 0x399   : > { %v1211_v5 = vrot.slane %v1173_v61, %v3220_v38 }
 0x39a   : > { %v1221_v54 = vsel %vm1220_vm0, %v1199_v53, %v1219_v34 }
 0x39b   : > { %v1171_v60 = vpop.xlane.xlu0 %1170  ;;  %v1223_v1 = vsel %vm1222_vm1, %v1203_v59, %v1221_v54 }
 0x39c   : > { %v1207_v0 = vrot.slane %v1171_v60, %v3220_v38 }
 0x39e   : > { %v1225_v2 = vsel %vm1224_vm2, %v1207_v0, %v1223_v1 }
 0x39f   : > { %v1175_v4 = vpop.xlane.xlu0 %1174  ;;  %v1227_v11 = vsel %vm1226_vm3, %v1211_v5, %v1225_v2 }
 0x3a0   : > { %v1215_v7 = vrot.slane %v1175_v4, %v3220_v38 }
 0x3a2   : > { %v1229_v12 = vsel %vm1228_vm4, %v1215_v7, %v1227_v11 }
 0x3a3   : > { %v1232_v3 = vsel %vm1231_vm5, %v1229_v12, -inf }
 0x3a4   : > { %1233 = vmax.xlane.f32.xlu1 %v1232_v3 }
 0x42d   : > { %v1234_v9 = vpop.xlane.xlu1 %1233 }
 0x42e   : > { %v1239_v15 = vrot.slane %v1234_v9, %v2970_v40  ;;  %v1243_v16 = vrot.slane %v1234_v9, %v3097_v46  ;;  %v1247_v19 = vrot.slane %v1234_v9, %v2983_v57  ;;  %v1251_v20 = vrot.slane %v1234_v9, %v3108_v55 }
 0x42f   : > { %v1255_v25 = vrot.slane %v1234_v9, %v3242_v13  ;;  %v1259_v29 = vrot.slane %v1234_v9, %v3246_v24  ;;  %v1263_v32 = vrot.slane %v1234_v9, %v3212_v18 }
 0x430   : > { %v1276_v8 = vsub.f32 %v1161_v37, %v1239_v15  ;;  %v1277_v14 = vsub.f32 %v1163_v39, %v1243_v16  ;;  %v1278_v21 = vsub.f32 %v1165_v43, %v1247_v19  ;;  %v1279_v26 = vsub.f32 %v1167_v50, %v1251_v20 }
 0x431   : > { %v1280_v30 = vsub.f32 %v1169_v48, %v1255_v25  ;;  %v1281_v35 = vsub.f32 %v1171_v60, %v1259_v29  ;;  %v1267_v39 = vrot.slane %v1234_v9, %v3251_v31  ;;  %v1282_v42 = vsub.f32 %v1173_v61, %v1263_v32 }
 0x432   : > { %v1284_v22 = vmul.f32 1.442695, %v1276_v8  ;;  %v1286_v23 = vmul.f32 1.442695, %v1277_v14  ;;  %v1288_v27 = vmul.f32 1.442695, %v1278_v21 }
 0x433   : > { %v1290_v41 = vmul.f32 1.442695, %v1279_v26  ;;  %v1292_v36 = vmul.f32 1.442695, %v1280_v30  ;;  %v1294_v43 = vmul.f32 1.442695, %v1281_v35  ;;  %v1283_v45 = vsub.f32 %v1175_v4, %v1267_v39 }
 0x434   : > { %2638 = vpow2.f32 %v1284_v22  ;;  %v1296_v47 = vmul.f32 1.442695, %v1282_v42 }
 0x435   : > { %2640 = vpow2.f32 %v1286_v23  ;;  %v1298_v33 = vmul.f32 1.442695, %v1283_v45 }
 0x436   : > { %2642 = vpow2.f32 %v1288_v27 }
 0x437   : > { %2644 = vpow2.f32 %v1290_v41 }
 0x438   : > { %2646 = vpow2.f32 %v1292_v36 }
 0x439   : > { %2648 = vpow2.f32 %v1294_v43 }
 0x43a   : > { %2650 = vpow2.f32 %v1296_v47 }
 0x43b   : > { %2652 = vpow2.f32 %v1298_v33 }
 0x441   : > { %v2639_v37 = vpop.eup %2638 }
 0x442   : > { %v2641_v44 = vpop.eup %2640  ;;  %1309 = vperm.xlu0 %2620, %v2639_v37  }
 0x443   : > { %1312 = vperm.xlu1 %2621, %v2641_v44   ;;  %v2643_v48 = vpop.eup %2642 }
 0x444   : > { %v2645_v50 = vpop.eup %2644 }
 0x445   : > { %v3255_v53 = vpop.eup %2646 }
 0x446   : > { %v3258_v34 = vpop.eup %2648 }
 0x447   : > { %1315 = vperm.xlu1 %2621, %v2643_v48   ;;  %v3261_v54 = vpop.eup %2650 }
 0x448   : > { %v3264_v59 = vpop.eup %2652 }
 0x44b   : > { %1318 = vperm.xlu1 %2621, %v2645_v50  }
 0x44f   : > { %1321 = vperm.xlu1 %2621, %v3255_v53  }
 0x453   : > { %1324 = vperm.xlu1 %2621, %v3258_v34  }
 0x457   : > { %1327 = vperm.xlu1 %2621, %v3261_v54  }
 0x45b   : > { %1330 = vperm.xlu1 %2621, %v3264_v59  }
 0x4bd   : > { %v1310_v2 = vpop.permute.xlu0 %1309 }
 0x4be   : > { %v1313_v60 = vpop.permute.xlu1 %1312  ;;  %v1335_v7 = vrot.slane %v1310_v2, %v3220_v38  ;;  %v2157_v2 = vld [vmem:[%s3495_s3 + $0x2e0] sm:$0xff] }
 0x4bf   : > { %v1339_v4 = vrot.slane %v1313_v60, %v3220_v38 }
 0x4c1   : > { %v1364_v15 = vsel %vm1216_vm11, %v1339_v4, %v1335_v7  ;;  %v2155_v7 = vld [vmem:[%s3495_s3 + $0x2d0] sm:$0xff] }
 0x4c2   : > { %v1316_v61 = vpop.permute.xlu1 %1315 }
 0x4c3   : > { %v1343_v11 = vrot.slane %v1316_v61, %v3220_v38 }
 0x4c5   : > { %v1365_v19 = vsel %vm1218_vm12, %v1343_v11, %v1364_v15  ;;  %v2149_v15 = vld [vmem:[%s3495_s3 + $0x2a0] sm:$0xff] }
 0x4c6   : > { %v1319_v0 = vpop.permute.xlu1 %1318 }
 0x4c7   : > { %v1347_v12 = vrot.slane %v1319_v0, %v3220_v38 }
 0x4c9   : > { %v1366_v14 = vsel %vm1220_vm0, %v1347_v12, %v1365_v19  ;;  %v2153_v12 = vld [vmem:[%s3495_s3 + $0x2c0] sm:$0xff]  ;;  %v2147_v19 = vld [vmem:[%s3495_s3 + $0x290] sm:$0xff] }
 0x4ca   : > { %v1322_v1 = vpop.permute.xlu1 %1321 }
 0x4cb   : > { %v1351_v3 = vrot.slane %v1322_v1, %v3220_v38 }
 0x4cd   : > { %v1367_v20 = vsel %vm1222_vm1, %v1351_v3, %v1366_v14  ;;  %v2151_v3 = vld [vmem:[%s3495_s3 + $0x2b0] sm:$0xff]  ;;  %v2145_v14 = vld [vmem:[%s3495_s3 + $0x280] sm:$0xff] }
 0x4ce   : > { %v1325_v5 = vpop.permute.xlu1 %1324 }
 0x4cf   : > { %v1355_v16 = vrot.slane %v1325_v5, %v3220_v38 }
 0x4d1   : > { %v1368_v22 = vsel %vm1224_vm2, %v1355_v16, %v1367_v20  ;;  %v2148_v16 = vld [vmem:[%s3495_s3 + $0x298] sm:$0xff] }
 0x4d2   : > { %v1328_v9 = vpop.permute.xlu1 %1327 }
 0x4d3   : > { %v1359_v8 = vrot.slane %v1328_v9, %v3220_v38  ;;  %v2150_v9 = vld [vmem:[%s3495_s3 + $0x2a8] sm:$0xff] }
 0x4d5   : > { %v1369_v25 = vsel %vm1226_vm3, %v1359_v8, %v1368_v22  ;;  %v2146_v8 = vld [vmem:[%s3495_s3 + $0x288] sm:$0xff] }
 0x4d6   : > { %v1331_v21 = vpop.permute.xlu1 %1330 }
 0x4d7   : > { %v1363_v23 = vrot.slane %v1331_v21, %v3220_v38 }
 0x4d9   : > { %v1370_v26 = vsel %vm1228_vm4, %v1363_v23, %v1369_v25 }
 0x4da   : > { %v1372_v27 = vsel %vm1231_vm5, %v1370_v26, 0.0 }
 0x4db   : > { %1373 = vadd.xlane.f32.xlu1 %v1372_v27 }
 0x564   : > { %v1374_v29 = vpop.xlane.xlu1 %1373 }
 0x565   : > { %v1379_v30 = vrot.slane %v1374_v29, %v2970_v40  ;;  %v1383_v41 = vrot.slane %v1374_v29, %v3097_v46  ;;  %v1387_v32 = vrot.slane %v1374_v29, %v2983_v57  ;;  %v1391_v35 = vrot.slane %v1374_v29, %v3108_v55 }
 0x566   : > { %v1395_v36 = vrot.slane %v1374_v29, %v3242_v13  ;;  %v1399_v43 = vrot.slane %v1374_v29, %v3246_v24  ;;  %v1403_v46 = vrot.slane %v1374_v29, %v3212_v18  ;;  %v1407_v55 = vrot.slane %v1374_v29, %v3251_v31  ;;  %v2159_v18 = vld [vmem:[%s3495_s3 + $0x2f0] sm:$0xff] }
 0x567   : > { %2654 = vrcp.f32 %v1379_v30 }
 0x568   : > { %2656 = vrcp.f32 %v1383_v41 }
 0x569   : > { %2658 = vrcp.f32 %v1387_v32 }
 0x56a   : > { %2660 = vrcp.f32 %v1391_v35 }
 0x56b   : > { %2662 = vrcp.f32 %v1395_v36 }
 0x56c   : > { %2664 = vrcp.f32 %v1399_v43 }
 0x56d   : > { %2666 = vrcp.f32 %v1403_v46 }
 0x56e   : > { %2668 = vrcp.f32 %v1407_v55 }
 0x574   : > { %v2655_v39 = vpop.eup %2654 }
 0x575   : > { %v1417_v42 = vmul.f32 %v2655_v39, %v2639_v37  ;;  %v2657_v45 = vpop.eup %2656 }
 0x576   : > { %v1419_v47 = vmul.f32 %v2657_v45, %v2641_v44  ;;  %v2659_v33 = vpop.eup %2658  ;;  %v2160_v44 = vld [vmem:[%s3495_s3 + $0x2f8] sm:$0xff] }
 0x577   : > { %1434 = vperm.xlu0 %2620, %v1417_v42   ;;  %v1421_v57 = vmul.f32 %v2659_v33, %v2643_v48  ;;  %v2661_v60 = vpop.eup %2660  ;;  %2501 = vmatpush3.msra.mxu1 %v2160_v44 }
 0x578   : > { %v1423_v61 = vmul.f32 %v2661_v60, %v2645_v50  ;;  %v2663_v37 = vpop.eup %2662  ;;  %2502 = vmatprep.subr.mxu1 %v2697_v17  ;;  %v2158_v50 = vld [vmem:[%s3495_s3 + $0x2e8] sm:$0xff] }
 0x579   : > { %v1425_v0 = vmul.f32 %v2663_v37, %v3255_v53  ;;  %v2665_v1 = vpop.eup %2664  ;;  %2503 = vmatpush3.msra.mxu1 %v2159_v18 }
 0x57a   : > { %v1427_v48 = vmul.f32 %v2665_v1, %v3258_v34  ;;  %2504 = vmatprep.subr.mxu1 %v2697_v17  ;;  %v2667_v53 = vpop.eup %2666  ;;  %v2156_v34 = vld [vmem:[%s3495_s3 + $0x2d8] sm:$0xff] }
 0x57b   : > { %1439 = vperm.xlu0 %2620, %v1419_v47   ;;  %2505 = vmatpush3.msra.mxu1 %v2158_v50  ;;  %v1429_v5 = vmul.f32 %v2667_v53, %v3261_v54  ;;  %v2669_v4 = vpop.eup %2668  ;;  %v2154_v54 = vld [vmem:[%s3495_s3 + $0x2c8] sm:$0xff] }
 0x57c   : > { %2506 = vmatprep.subr.mxu1 %v2697_v17  ;;  %v1431_v11 = vmul.f32 %v2669_v4, %v3264_v59  ;;  %v2152_v59 = vld [vmem:[%s3495_s3 + $0x2b8] sm:$0xff] }
 0x57d   : > { %2507 = vmatpush3.msra.mxu1 %v2157_v2 }
 0x57e   : > { %2508 = vmatprep.subr.mxu1 %v2697_v17 }
 0x57f   : > { %1444 = vperm.xlu0 %2620, %v1421_v57   ;;  %2509 = vmatpush3.msra.mxu1 %v2156_v34 }
 0x580   : > { %2510 = vmatprep.subr.mxu1 %v2697_v17 }
 0x581   : > { %2511 = vmatpush3.msra.mxu1 %v2155_v7 }
 0x582   : > { %2512 = vmatprep.subr.mxu1 %v2697_v17 }
 0x583   : > { %1449 = vperm.xlu0 %2620, %v1423_v61   ;;  %2513 = vmatpush3.msra.mxu1 %v2154_v54 }
 0x584   : > { %2514 = vmatprep.subr.mxu1 %v2697_v17 }
 0x585   : > { %2515 = vmatpush3.msra.mxu1 %v2153_v12 }
 0x586   : > { %2516 = vmatprep.subr.mxu1 %v2697_v17 }
 0x587   : > { %1454 = vperm.xlu0 %2620, %v1425_v0   ;;  %2517 = vmatpush3.msra.mxu1 %v2152_v59 }
 0x588   : > { %2518 = vmatprep.subr.mxu1 %v2697_v17 }
 0x589   : > { %2519 = vmatpush3.msra.mxu1 %v2151_v3 }
 0x58a   : > { %2520 = vmatprep.subr.mxu1 %v2697_v17 }
 0x58b   : > { %1459 = vperm.xlu0 %2620, %v1427_v48   ;;  %2521 = vmatpush3.msra.mxu1 %v2150_v9 }
 0x58c   : > { %2522 = vmatprep.subr.mxu1 %v2697_v17 }
 0x58d   : > { %2523 = vmatpush3.msra.mxu1 %v2149_v15 }
 0x58e   : > { %2524 = vmatprep.subr.mxu1 %v2697_v17 }
 0x58f   : > { %1464 = vperm.xlu0 %2620, %v1429_v5   ;;  %2525 = vmatpush3.msra.mxu1 %v2148_v16 }
 0x590   : > { %2526 = vmatprep.subr.mxu1 %v2697_v17 }
 0x591   : > { %2527 = vmatpush3.msra.mxu1 %v2147_v19 }
 0x592   : > { %2528 = vmatprep.subr.mxu1 %v2697_v17 }
 0x593   : > { %1469 = vperm.xlu0 %2620, %v1431_v11   ;;  %2529 = vmatpush3.msra.mxu1 %v2146_v8 }
 0x594   : > { %2530 = vmatprep.subr.mxu1 %v2697_v17 }
 0x595   : > { %2531 = vmatpush3.msra.mxu1 %v2145_v14 }
 0x596   : > { %2570 = vmatprep.subr.mxu1 %v2697_v17 }
 0x5f2   : > { %v1435_v20 = vpop.permute.xlu0 %1434 }
 0x5f3   : > { %v1472_v26 = vmul.f32 %v1435_v20, %v3101_v51 }
 0x5f5   : > { %v1480_v32 = vrot.slane %v1472_v26, 4 }
 0x5f6   : > { %v1440_v21 = vpop.permute.xlu0 %1439 }
 0x5f7   : > { %v1473_v23 = vmul.f32 %v1440_v21, %v3103_v52  ;;  %v1481_v45 = vadd.f32 %v1480_v32, %v1472_v26 }
 0x5f9   : > { %v1486_v29 = vrot.slane %v1473_v23, 4  ;;  %v1482_v37 = vrot.slane %v1481_v45, 2 }
 0x5fa   : > { %v1445_v22 = vpop.permute.xlu0 %1444 }
 0x5fb   : > { %v1474_v25 = vmul.f32 %v1445_v22, %v3110_v56  ;;  %v1487_v39 = vadd.f32 %v1486_v29, %v1473_v23  ;;  %v1483_v5 = vadd.f32 %v1482_v37, %v1481_v45  ;;  %v2175_v37 = vld [vmem:[%s3495_s3 + $0x370] sm:$0xff] }
 0x5fd   : > { %v1492_v41 = vrot.slane %v1474_v25, 4  ;;  %v1488_v57 = vrot.slane %v1487_v39, 2  ;;  %v1484_v16 = vrot.slane %v1483_v5, 1 }
 0x5fe   : > { %v1450_v27 = vpop.permute.xlu0 %1449 }
 0x5ff   : > { %v1475_v30 = vmul.f32 %v1450_v27, %v3112_v58  ;;  %v1493_v43 = vadd.f32 %v1492_v41, %v1474_v25  ;;  %v1489_v48 = vadd.f32 %v1488_v57, %v1487_v39  ;;  %v1485_v27 = vadd.f32 %v1484_v16, %v1483_v5  ;;  %v2166_v5 = vld [vmem:[%s3495_s3 + $0x328] sm:$0xff] }
 0x601   : > { %v1498_v35 = vrot.slane %v1475_v30, 4  ;;  %v1494_v61 = vrot.slane %v1493_v43, 2  ;;  %v1490_v12 = vrot.slane %v1489_v48, 1 }
 0x602   : > { %v1455_v36 = vpop.permute.xlu0 %1454 }
 0x603   : > { %v1476_v42 = vmul.f32 %v1455_v36, %v3118_v62  ;;  %v1499_v47 = vadd.f32 %v1498_v35, %v1475_v30  ;;  %v1495_v2 = vadd.f32 %v1494_v61, %v1493_v43  ;;  %v1491_v21 = vadd.f32 %v1490_v12, %v1489_v48  ;;  %v2170_v48 = vld [vmem:[%s3495_s3 + $0x348] sm:$0xff]  ;;  %v2686_v12 = vld [vmem:[%s3496_s4] sm:$0xff] }
 0x605   : > { %v1504_v46 = vrot.slane %v1476_v42, 4  ;;  %v1500_v0 = vrot.slane %v1499_v47, 2  ;;  %v1496_v15 = vrot.slane %v1495_v2, 1  ;;  %v1570_v35 = vsel %vm1216_vm11, %v1491_v21, %v1485_v27 }
 0x606   : > { %v1460_v33 = vpop.permute.xlu0 %1459 }
 0x607   : > { %v1505_v55 = vadd.f32 %v1504_v46, %v1476_v42  ;;  %v1477_v60 = vmul.f32 %v1460_v33, %v3120_v63  ;;  %v1501_v34 = vadd.f32 %v1500_v0, %v1499_v47  ;;  %v1497_v26 = vadd.f32 %v1496_v15, %v1495_v2  ;;  %v2174_v0 = vld [vmem:[%s3495_s3 + $0x368] sm:$0xff]  ;;  %v2167_v2 = vld [vmem:[%s3495_s3 + $0x330] sm:$0xff] }
 0x609   : > { %v1510_v44 = vrot.slane %v1477_v60, 4  ;;  %v1506_v1 = vrot.slane %v1505_v55, 2  ;;  %v1502_v19 = vrot.slane %v1501_v34, 1  ;;  %v1571_v42 = vsel %vm1218_vm12, %v1497_v26, %v1570_v35 }
 0x60a   : > { %v1465_v18 = vpop.permute.xlu0 %1464 }
 0x60b   : > { %v1511_v50 = vadd.f32 %v1510_v44, %v1477_v60  ;;  %v1478_v53 = vmul.f32 %v1465_v18, %v3127_v6  ;;  %v1507_v11 = vadd.f32 %v1506_v1, %v1505_v55  ;;  %v1503_v29 = vadd.f32 %v1502_v19, %v1501_v34  ;;  %v2176_v60 = vld [vmem:[%s3495_s3 + $0x378] sm:$0xff]  ;;  %v2173_v44 = vld [vmem:[%s3495_s3 + $0x360] sm:$0xff]  ;;  %v2171_v18 = vld [vmem:[%s3495_s3 + $0x350] sm:$0xff] }
 0x60c   : > { %v2172_v1 = vld [vmem:[%s3495_s3 + $0x358] sm:$0xff]  ;;  %v2165_v34 = vld [vmem:[%s3495_s3 + $0x320] sm:$0xff] }
 0x60d   : > { %v1512_v4 = vrot.slane %v1511_v50, 2  ;;  %v1516_v7 = vrot.slane %v1478_v53, 4  ;;  %v1508_v20 = vrot.slane %v1507_v11, 1  ;;  %v1572_v45 = vsel %vm1220_vm0, %v1503_v29, %v1571_v42 }
 0x60e   : > { %v1470_v54 = vpop.permute.xlu0 %1469 }
 0x60f   : > { %v1513_v59 = vadd.f32 %v1512_v4, %v1511_v50  ;;  %v1517_v3 = vadd.f32 %v1516_v7, %v1478_v53  ;;  %v1479_v9 = vmul.f32 %v1470_v54, %v3129_v10  ;;  %v1509_v32 = vadd.f32 %v1508_v20, %v1507_v11  ;;  %v2169_v50 = vld [vmem:[%s3495_s3 + $0x340] sm:$0xff]  ;;  %v2168_v53 = vld [vmem:[%s3495_s3 + $0x338] sm:$0xff]  ;;  %v2163_v7 = vld [vmem:[%s3495_s3 + $0x310] sm:$0xff] }
 0x610   : > { %v2164_v4 = vld [vmem:[%s3495_s3 + $0x318] sm:$0xff]  ;;  %v2162_v11 = vld [vmem:[%s3495_s3 + $0x308] sm:$0xff]  ;;  %v2161_v54 = vld [vmem:[%s3495_s3 + $0x300] sm:$0xff] }
 0x611   : > { %v1518_v8 = vrot.slane %v1517_v3, 2  ;;  %v1522_v14 = vrot.slane %v1479_v9, 4  ;;  %v1514_v22 = vrot.slane %v1513_v59, 1  ;;  %v1573_v46 = vsel %vm1222_vm1, %v1509_v32, %v1572_v45 }
 0x613   : > { %v1519_v23 = vadd.f32 %v1518_v8, %v1517_v3  ;;  %v1523_v25 = vadd.f32 %v1522_v14, %v1479_v9  ;;  %v1515_v36 = vadd.f32 %v1514_v22, %v1513_v59  ;;  %v1721_v59 = vrot.slane %v2686_v12, %v3242_v13 }
 0x614   : > { %v1744_v8 = vrot.slane %v2686_v12, %v3246_v24 }
 0x615   : > { %v1520_v30 = vrot.slane %v1519_v23, 1  ;;  %v1524_v41 = vrot.slane %v1523_v25, 2  ;;  %v1574_v57 = vsel %vm1224_vm2, %v1515_v36, %v1573_v46 }
 0x617   : > { %v1525_v39 = vadd.f32 %v1524_v41, %v1523_v25  ;;  %v1521_v43 = vadd.f32 %v1520_v30, %v1519_v23 }
 0x619   : > { %v1526_v47 = vrot.slane %v1525_v39, 1  ;;  %v1575_v55 = vsel %vm1226_vm3, %v1521_v43, %v1574_v57 }
 0x61b   : > { %v1527_v33 = vadd.f32 %v1526_v47, %v1525_v39 }
 0x61d   : > { %v1576_v61 = vsel %vm1228_vm4, %v1527_v33, %v1575_v55  ;;  %v1925_v55 = vrot.slane %v2686_v12, %v3251_v31 }
 0x61e   : > { %2533 = vmatmul.mubr.f32.vlgmr.msra.gmra.mxu1 %v1576_v61 }
 0x61f   : > { %2571 = vmatpush3.msra.mxu1 %v2176_v60  ;;  %2602 = vmatprep.mubr.msk.f32.mxu1 %vm2699_vm15, %v2697_v17 }
 0x620   : > { %2572 = vmatprep.subr.mxu1 %v2697_v17 }
 0x621   : > { %2573 = vmatpush3.msra.mxu1 %v2175_v37 }
 0x622   : > { %2574 = vmatprep.subr.mxu1 %v2697_v17 }
 0x623   : > { %2575 = vmatpush3.msra.mxu1 %v2174_v0 }
 0x624   : > { %2576 = vmatprep.subr.mxu1 %v2697_v17 }
 0x625   : > { %2577 = vmatpush3.msra.mxu1 %v2173_v44 }
 0x626   : > { %2578 = vmatprep.subr.mxu1 %v2697_v17 }
 0x627   : > { %2579 = vmatpush3.msra.mxu1 %v2172_v1 }
 0x628   : > { %2580 = vmatprep.subr.mxu1 %v2697_v17 }
 0x629   : > { %2581 = vmatpush3.msra.mxu1 %v2171_v18 }
 0x62a   : > { %2582 = vmatprep.subr.mxu1 %v2697_v17 }
 0x62b   : > { %2583 = vmatpush3.msra.mxu1 %v2170_v48 }
 0x62c   : > { %2584 = vmatprep.subr.mxu1 %v2697_v17 }
 0x62d   : > { %2585 = vmatpush3.msra.mxu1 %v2169_v50 }
 0x62e   : > { %2586 = vmatprep.subr.mxu1 %v2697_v17 }
 0x62f   : > { %2587 = vmatpush3.msra.mxu1 %v2168_v53 }
 0x630   : > { %2588 = vmatprep.subr.mxu1 %v2697_v17 }
 0x631   : > { %2589 = vmatpush3.msra.mxu1 %v2167_v2 }
 0x632   : > { %2590 = vmatprep.subr.mxu1 %v2697_v17 }
 0x633   : > { %2591 = vmatpush3.msra.mxu1 %v2166_v5 }
 0x634   : > { %2592 = vmatprep.subr.mxu1 %v2697_v17 }
 0x635   : > { %2593 = vmatpush3.msra.mxu1 %v2165_v34 }
 0x636   : > { %2594 = vmatprep.subr.mxu1 %v2697_v17 }
 0x637   : > { %2595 = vmatpush3.msra.mxu1 %v2164_v4 }
 0x638   : > { %2596 = vmatprep.subr.mxu1 %v2697_v17 }
 0x639   : > { %2597 = vmatpush3.msra.mxu1 %v2163_v7 }
 0x63a   : > { %2598 = vmatprep.subr.mxu1 %v2697_v17 }
 0x63b   : > { %2599 = vmatpush3.msra.mxu1 %v2162_v11 }
 0x63c   : > { %2600 = vmatprep.subr.mxu1 %v2697_v17 }
 0x63d   : > { %2601 = vmatpush3.msra.mxu1 %v2161_v54 }
 0x6de   : > { %v1644_v3 = vpop.f32.mrf.mxu1 }
 0x6df   : > { %v1715_v9 = vadd.f32 %v3216_v28, %v1644_v3 }
 0x6e0   : > { %v2534_v15 = vpop.f32.mrf.mxu1 }
 0x6e1   : > { %v1722_v16 = vadd.f32 %v1721_v59, %v1715_v9 }
 0x6e3   : > { %v1723_v19 = vmax.f32 %v1722_v16, 0.0 }
 0x6e5   : > { %2603 = vmatmul.mubr.f32.vlgmr.msra.gmra.mxu1 %v1723_v19 }
 0x7a5   : > { %v1811_v14 = vpop.f32.mrf.mxu1 }
 0x7a6   : > { %v1812_v20 = vadd.f32 %v1811_v14, %v1744_v8 }
 0x7a7   : > { %v2604_v21 = vpop.f32.mrf.mxu1 }
 0x7a8   : > { %v1815_v17 = vmax.f32 %v1812_v20, 0.0 }
 0x7aa   : > { %v1817_v22 = vcombine.high %v1815_v17, %v1815_v17  ;;  %v1824_v23 = vrot.slane %v1815_v17, %v2830_v49 }
 0x7ac   : > { %v1831_v25 = vrot.slane %v1817_v22, %v2830_v49  ;;  %v1832_v26 = vcombine.high %v1824_v23, %v1824_v23  ;;  %v1840_v13 = vrot.slane %v1824_v23, %v2830_v49 }
 0x7ae   : > { %v1854_v28 = vrot.slane %v1832_v26, %v2830_v49  ;;  %v1862_v27 = vcombine.high %v1840_v13, %v1840_v13  ;;  %v1847_v29 = vrot.slane %v1831_v25, %v2830_v49  ;;  %v1869_v30 = vrot.slane %v1840_v13, %v2970_v40 }
 0x7af   : > { %v1833_v35 = vcombine.high %v1831_v25, %v1831_v25 }
 0x7b0   : > { %v1873_v24 = vrot.slane %v1854_v28, %v2970_v40  ;;  %v1877_v41 = vrot.slane %v1862_v27, %v2970_v40  ;;  %v1906_v32 = vadd.f32 %v1869_v30, %v3101_v51  ;;  %v1864_v36 = vcombine.high %v1854_v28, %v1854_v28 }
 0x7b1   : > { %v1885_v39 = vrot.slane %v1847_v29, %v2970_v40  ;;  %v1861_v45 = vrot.slane %v1833_v35, %v2830_v49  ;;  %v1863_v33 = vcombine.high %v1847_v29, %v1847_v29 }
 0x7b2   : > { %v1907_v42 = vadd.f32 %v1873_v24, %v3103_v52  ;;  %v1908_v43 = vadd.f32 %v1877_v41, %v3110_v56  ;;  %2670 = vtanh.f32 %v1906_v32  ;;  %v1881_v47 = vrot.slane %v1864_v36, %v2970_v40 }
 0x7b3   : > { %v1910_v46 = vadd.f32 %v1885_v39, %v3118_v62  ;;  %v1889_v51 = vrot.slane %v1861_v45, %v2970_v40  ;;  %v1865_v52 = vcombine.high %v1861_v45, %v1861_v45  ;;  %v1893_v56 = vrot.slane %v1863_v33, %v2970_v40 }
 0x7b4   : > { %2672 = vtanh.f32 %v1907_v42  ;;  %v1909_v57 = vadd.f32 %v1881_v47, %v3112_v58 }
 0x7b5   : > { %2674 = vtanh.f32 %v1908_v43  ;;  %v1911_v60 = vadd.f32 %v1889_v51, %v3120_v63  ;;  %v1897_v62 = vrot.slane %v1865_v52, %v2970_v40  ;;  %v1912_v0 = vadd.f32 %v1893_v56, %v3127_v6 }
 0x7b6   : > { %2676 = vtanh.f32 %v1910_v46 }
 0x7b7   : > { %2678 = vtanh.f32 %v1909_v57  ;;  %v1913_v31 = vadd.f32 %v1897_v62, %v3129_v10 }
 0x7b8   : > { %2680 = vtanh.f32 %v1911_v60 }
 0x7b9   : > { %2682 = vtanh.f32 %v1912_v0 }
 0x7ba   : > { %2684 = vtanh.f32 %v1913_v31 }
 0x7bf   : > { %v2671_v49 = vpop.eup %2670 }
 0x7c0   : > { %v1926_v61 = vmul.f32 %v2671_v49, %v1925_v55 }
 0x7c1   : > { %v2673_v37 = vpop.eup %2672 }
 0x7c2   : > { %1934 = vadd.xlane.f32.xlu0 %v1926_v61  ;;  %v1927_v44 = vmul.f32 %v2673_v37, %v1925_v55  ;;  %v2675_v58 = vpop.eup %2674 }
 0x7c3   : > { %v1928_v1 = vmul.f32 %v2675_v58, %v1925_v55  ;;  %v2677_v18 = vpop.eup %2676 }
 0x7c4   : > { %1936 = vadd.xlane.f32.xlu1 %v1927_v44  ;;  %v1930_v63 = vmul.f32 %v2677_v18, %v1925_v55  ;;  %v2679_v48 = vpop.eup %2678 }
 0x7c5   : > { %v1929_v50 = vmul.f32 %v2679_v48, %v1925_v55  ;;  %v2681_v40 = vpop.eup %2680 }
 0x7c6   : > { %v1931_v6 = vmul.f32 %v2681_v40, %v1925_v55  ;;  %v2683_v53 = vpop.eup %2682 }
 0x7c7   : > { %v1932_v2 = vmul.f32 %v2683_v53, %v1925_v55  ;;  %v2685_v5 = vpop.eup %2684 }
 0x7c8   : > { %1938 = vadd.xlane.f32.xlu1 %v1928_v1  ;;  %v1933_v10 = vmul.f32 %v2685_v5, %v1925_v55 }
 0x7cc   : > { %1942 = vadd.xlane.f32.xlu1 %v1930_v63 }
 0x7d0   : > { %1940 = vadd.xlane.f32.xlu1 %v1929_v50 }
 0x7d4   : > { %1944 = vadd.xlane.f32.xlu1 %v1931_v6 }
 0x7d8   : > { %1946 = vadd.xlane.f32.xlu1 %v1932_v2 }
 0x7dc   : > { %1948 = vadd.xlane.f32.xlu1 %v1933_v10 }
 0x84b   : > { %v1935_v54 = vpop.xlane.xlu0 %1934 }
 0x84c   : > { %v1961_v9 = vrot.slane %v1935_v54, %v3220_v38 }
 0x84d   : > { %v1937_v34 = vpop.xlane.xlu1 %1936 }
 0x84e   : > { %v1965_v12 = vrot.slane %v1937_v34, %v3220_v38 }
 0x850   : > { %v1990_v16 = vsel %vm1216_vm11, %v1965_v12, %v1961_v9 }
 0x851   : > { %v1939_v4 = vpop.xlane.xlu1 %1938 }
 0x852   : > { %v1969_v59 = vrot.slane %v1939_v4, %v3220_v38 }
 0x854   : > { %v1991_v19 = vsel %vm1218_vm12, %v1969_v59, %v1990_v16 }
 0x855   : > { %v1943_v7 = vpop.xlane.xlu1 %1942 }
 0x856   : > { %v1977_v21 = vrot.slane %v1943_v7, %v3220_v38 }
 0x859   : > { %v1941_v11 = vpop.xlane.xlu1 %1940 }
 0x85a   : > { %v1973_v15 = vrot.slane %v1941_v11, %v3220_v38 }
 0x85c   : > { %v1992_v14 = vsel %vm1220_vm0, %v1973_v15, %v1991_v19 }
 0x85d   : > { %v1945_v3 = vpop.xlane.xlu1 %1944  ;;  %v1993_v22 = vsel %vm1222_vm1, %v1977_v21, %v1992_v14 }
 0x85e   : > { %v1981_v20 = vrot.slane %v1945_v3, %v3220_v38 }
 0x860   : > { %v1994_v25 = vsel %vm1224_vm2, %v1981_v20, %v1993_v22 }
 0x861   : > { %v1947_v8 = vpop.xlane.xlu1 %1946 }
 0x862   : > { %v1985_v17 = vrot.slane %v1947_v8, %v3220_v38 }
 0x864   : > { %v1995_v13 = vsel %vm1226_vm3, %v1985_v17, %v1994_v25 }
 0x865   : > { %v1949_v23 = vpop.xlane.xlu1 %1948 }
 0x866   : > { %v1989_v26 = vrot.slane %v1949_v23, %v3220_v38 }
 0x868   : > { %v1996_v28 = vsel %vm1228_vm4, %v1989_v26, %v1995_v13 }
 0x869   : > { %1998 = vst.msk [vmem:[%s243_s8] sm:$0xff] %vm1231_vm5, %v1996_v28 }
 0x86a PF: > { %s15_s18 = sadd.s32 1, %s2693_s18  }
 0x86b   : > { %p12_p5 = scmp.ge.s32.totalorder %s15_s18, 5  }
 0x86d   :  { %14 = sbr.rel (!%p12_p5) target bundleno = 1 (0x1), region = 79 }

</bundles_post_ra>
